<compile_context>
chip_gen: v7x
topology: tpu7x:2x2x1
jax: 0.10.0
libtpu: 0.0.40
codegen_flags: <defaults>
</compile_context>

<pallas_src>
import functools

import jax
import jax.numpy as jnp
from jax.experimental import pallas as pl
from jax.experimental.pallas import tpu as pltpu

KH = 3
KW = 3
K_PAD = 128    # MXU contraction width (VMEM-only padding; patches never hit HBM)
OC_PAD = 128   # MXU output-lane width for the resident weight (64 KiB, read once)


# ----------------------------- Pallas kernels ------------------------------

def _build_patch_tile(x_ref, pat_ref, h, w, c):
    """In-kernel im2col for one padded image (3x3, stride 1, pad 1).

    x_ref:   [1, h+2, w+2, c]  padded NHWC image block (VMEM)
    pat_ref: [h*w, K_PAD] f32  scratch; columns [0, 9*c) receive the taps in
                               (kh, kw, c) order, the tail stays zero so the
                               zero rows of the padded weight contribute 0.
    """
    pat_ref[...] = jnp.zeros(pat_ref.shape, pat_ref.dtype)
    for kh in range(KH):
        for kw in range(KW):
            col = (kh * KW + kw) * c
            tap = x_ref[0, kh:kh + h, kw:kw + w, :]          # (h, w, c)
            pat_ref[:, col:col + c] = tap.reshape(h * w, c)


def _conv_relu_kernel(x_ref, wgt_ref, b_ref, o_ref, pat_ref, *, h, w, c, oc):
    """Fused im2col + matmul + bias + ReLU for one image.

    wgt_ref: [K_PAD, OC_PAD] f32 (zero-padded), b_ref: [1, oc],
    o_ref:   [h*w, oc] f32 (only the real output columns are written back).
    """
    _build_patch_tile(x_ref, pat_ref, h, w, c)
    acc = jnp.dot(pat_ref[...], wgt_ref[...],
                  preferred_element_type=jnp.float32)        # (h*w, OC_PAD)
    o_ref[...] = jnp.maximum(acc[:, :oc] + b_ref[...], 0.0)


def _fused_mse_kernel(x_ref, wq_ref, wf_ref, b_ref, psum_ref, pat_ref, *,
                      h, w, c, oc):
    """Quant + float forward sharing one patch tile; per-image partial SSE.

    psum_ref: [1, 1, oc] f32 per-grid-step partial sum of (q - f)^2 — the grid
    is fully parallel (no serialized accumulator); the wrapper does the final
    tiny reduction and the 1/count scaling.
    """
    _build_patch_tile(x_ref, pat_ref, h, w, c)
    pat = pat_ref[...]
    b = b_ref[...]
    q = jnp.maximum(
        jnp.dot(pat, wq_ref[...], preferred_element_type=jnp.float32)[:, :oc] + b,
        0.0)
    f = jnp.maximum(
        jnp.dot(pat, wf_ref[...], preferred_element_type=jnp.float32)[:, :oc] + b,
        0.0)
    d = q - f
    psum_ref[...] = jnp.sum(d * d, axis=0, keepdims=True).reshape(1, 1, oc)


# ------------------------------- wrappers ----------------------------------

def _fake_quant_weight(w2d):
    """Symmetric per-tensor int8 fake-quant (plain jnp; XLA fuses it with prep)."""
    scale = jnp.maximum(jnp.max(jnp.abs(w2d)) / 127.0, 1e-8)
    # TODO(synk): confirm the Vitis-AI quantizer convention (power-of-two scale
    # and the exact (quant_min, quant_max)) before trusting SQNR/MSE numbers.
    return jnp.clip(jnp.round(w2d / scale), -128.0, 127.0) * scale


def _prep(x_nchw, weight_oihw, bias):
    n, c, h, w = x_nchw.shape
    oc, _, kh, kw = weight_oihw.shape
    assert (kh, kw) == (KH, KW)
    k = c * kh * kw
    assert k <= K_PAD and oc <= OC_PAD
    # NHWC + 1-pixel halo; the 9x im2col expansion never materializes in HBM.
    xp = jnp.pad(jnp.transpose(x_nchw, (0, 2, 3, 1)).astype(jnp.float32),
                 ((0, 0), (1, 1), (1, 1), (0, 0)))           # (n, h+2, w+2, c)
    # OIHW -> (kh, kw, c, oc) -> [k, oc], matching the in-kernel tap order.
    w2d = jnp.transpose(weight_oihw, (2, 3, 1, 0)).reshape(k, oc)
    w2d = w2d.astype(jnp.float32)
    b2d = bias.reshape(1, oc).astype(jnp.float32)
    return xp, w2d, b2d, (n, c, h, w, oc, k)


def _pad_weight(w2d):
    k, oc = w2d.shape
    return jnp.pad(w2d, ((0, K_PAD - k), (0, OC_PAD - oc)))


@functools.partial(jax.jit, static_argnames=("quantize",))
def conv2d_relu(x_nchw, weight_oihw, bias, *, quantize):
    xp, w2d, b2d, (n, c, h, w, oc, k) = _prep(x_nchw, weight_oihw, bias)
    wgt = _pad_weight(_fake_quant_weight(w2d) if quantize else w2d)
    m = n * h * w
    tm = h * w                                   # one image per grid step

    kernel = functools.partial(_conv_relu_kernel, h=h, w=w, c=c, oc=oc)
    cost = pl.CostEstimate(
        flops=2 * m * K_PAD * OC_PAD,
        transcendentals=0,
        bytes_accessed=xp.size * 4 + K_PAD * OC_PAD * 4 + m * oc * 4 + oc * 4)

    out2d = pl.pallas_call(
        kernel,
        out_shape=jax.ShapeDtypeStruct((m, oc), jnp.float32),
        grid=(n,),
        in_specs=[
            pl.BlockSpec((1, h + 2, w + 2, c), lambda i: (i, 0, 0, 0)),
            pl.BlockSpec((K_PAD, OC_PAD), lambda i: (0, 0)),   # resident weight
            pl.BlockSpec((1, oc), lambda i: (0, 0)),           # resident bias
        ],
        out_specs=pl.BlockSpec((tm, oc), lambda i: (i, 0)),    # real columns only
        scratch_shapes=[pltpu.VMEM((tm, K_PAD), jnp.float32)], # patch tile
        compiler_params=pltpu.CompilerParams(
            dimension_semantics=("parallel",)),                # megacore on v7x
        cost_estimate=cost,
    )(xp, wgt, b2d)

    out = out2d.reshape(n, h, w, oc)
    # Transpose only the real-size output; consumers that accept NHWC can skip it.
    return jnp.transpose(out, (0, 3, 1, 2))                    # back to NCHW


@jax.jit
def fused_quant_float_mse(x_nchw, weight_oihw, bias):
    """Single-kernel F.mse_loss(quant_forward(x), float_forward(x))."""
    xp, w2d, b2d, (n, c, h, w, oc, k) = _prep(x_nchw, weight_oihw, bias)
    wq = _pad_weight(_fake_quant_weight(w2d))
    wf = _pad_weight(w2d)
    m = n * h * w
    tm = h * w

    kernel = functools.partial(_fused_mse_kernel, h=h, w=w, c=c, oc=oc)
    cost = pl.CostEstimate(
        flops=4 * m * K_PAD * OC_PAD,
        transcendentals=0,
        bytes_accessed=xp.size * 4 + 2 * K_PAD * OC_PAD * 4 + n * oc * 4 + oc * 4)

    psums = pl.pallas_call(
        kernel,
        out_shape=jax.ShapeDtypeStruct((n, 1, oc), jnp.float32),
        grid=(n,),
        in_specs=[
            pl.BlockSpec((1, h + 2, w + 2, c), lambda i: (i, 0, 0, 0)),
            pl.BlockSpec((K_PAD, OC_PAD), lambda i: (0, 0)),
            pl.BlockSpec((K_PAD, OC_PAD), lambda i: (0, 0)),
            pl.BlockSpec((1, oc), lambda i: (0, 0)),
        ],
        out_specs=pl.BlockSpec((1, 1, oc), lambda i: (i, 0, 0)),
        scratch_shapes=[pltpu.VMEM((tm, K_PAD), jnp.float32)],
        compiler_params=pltpu.CompilerParams(
            dimension_semantics=("parallel",)),   # independent partial sums
        cost_estimate=cost,
    )(xp, wq, wf, b2d)

    return jnp.sum(psums) / float(m * oc)


class AdvancedQuantProcessor:
    """JAX/Pallas analogue: quant-model forward + layer-wise MSE evaluation.

    The torch module's forward is `self._quant_model(inputs)`; here the quant
    model is a fake-quantized Conv2d(4->8, 3x3, pad=1) + ReLU (the CONV2D->RELU
    pattern adaquant searches for), and the float model is the same layer
    without weight fake-quant.
    """

    def __init__(self, weight_oihw, bias):
        self._weight = weight_oihw
        self._bias = bias

    def forward(self, inputs):                  # == quant_model(inputs)
        return conv2d_relu(inputs, self._weight, self._bias, quantize=True)

    def float_forward(self, inputs):            # == _float_model(inputs)
        return conv2d_relu(inputs, self._weight, self._bias, quantize=False)

    def eval_loss(self, inputs):                # F.mse_loss(quant_out, float_out)
        return fused_quant_float_mse(inputs, self._weight, self._bias)

    # TODO(synk): the Adam-based per-layer finetuning loop, forward hooks,
    # SQNR bookkeeping and quantizer-graph traversal are host-side
    # orchestration with no Pallas kernel equivalent; only the forward / loss
    # hot paths are implemented.


if __name__ == "__main__":
    key = jax.random.PRNGKey(0)
    k_x, k_w, k_b = jax.random.split(key, 3)

    N, C, H, W = 2, 4, 16, 16
    OC = 8

    x = jax.random.normal(k_x, (N, C, H, W), dtype=jnp.float32)
    weight = 0.1 * jax.random.normal(k_w, (OC, C, KH, KW), dtype=jnp.float32)
    bias = 0.1 * jax.random.normal(k_b, (OC,), dtype=jnp.float32)

    proc = AdvancedQuantProcessor(weight, bias)

    q_out = jax.block_until_ready(proc.forward(x))
    f_out = jax.block_until_ready(proc.float_forward(x))
    loss = float(jax.block_until_ready(proc.eval_loss(x)))

    assert q_out.shape == (N, OC, H, W)
    assert f_out.shape == (N, OC, H, W)
    assert bool(jnp.all(q_out >= 0.0)) and bool(jnp.all(f_out >= 0.0))  # ReLU
    assert loss >= 0.0 and bool(jnp.isfinite(loss))

    # float path must match an XLA conv reference (validates in-kernel im2col
    # tap ordering and the weight layout).
    ref = jax.lax.conv_general_dilated(
        x, weight, window_strides=(1, 1), padding="SAME",
        dimension_numbers=("NCHW", "OIHW", "NCHW"),
        precision=jax.lax.Precision.HIGHEST)
    ref = jnp.maximum(ref + bias.reshape(1, OC, 1, 1), 0.0)
    assert float(jnp.max(jnp.abs(f_out - ref))) < 5e-2

    # fused-loss kernel must agree with the two separate forwards.
    ref_loss = float(jnp.mean((q_out - f_out) ** 2))
    assert abs(loss - ref_loss) <= 1e-5 + 1e-3 * abs(ref_loss)

    print("KERNEL_OK")
</pallas_src>

<mosaic_0001>
module attributes {stable_mosaic.version = 11 : i64} {
  func.func @_conv_relu_kernel(%arg0: i32, %arg1: memref<1x18x18x4xf32, #tpu.memory_space<vmem>>, %arg2: memref<128x128xf32, #tpu.memory_space<vmem>>, %arg3: memref<1x8xf32, #tpu.memory_space<vmem>>, %arg4: memref<256x8xf32, #tpu.memory_space<vmem>>, %arg5: memref<256x128xf32, #tpu.memory_space<vmem>>) attributes {dimension_semantics = [#tpu.dimension_semantics<parallel>], iteration_bounds = array<i64: 2>, scalar_prefetch = 0 : i64, scratch_operands = 1 : i64, tpu.core_type = #tpu.core_type<tc>, window_params = [{transform_indices = @transform_0, window_bounds = array<i64: 1, 18, 18, 4>}, {pipeline_mode = #tpu.pipeline_mode<synchronous>, transform_indices = @transform_1, window_bounds = array<i64: 128, 128>}, {pipeline_mode = #tpu.pipeline_mode<synchronous>, transform_indices = @transform_2, window_bounds = array<i64: 1, 8>}, {transform_indices = @transform_3, window_bounds = array<i64: 256, 8>}]} {
    %cst = arith.constant 0.000000e+00 : f32
    %0 = vector.broadcast %cst : f32 to vector<256x128xf32>
    %c0 = arith.constant 0 : index
    %c0_0 = arith.constant 0 : index
    %1 = vector.load %arg5[%c0, %c0_0] : memref<256x128xf32, #tpu.memory_space<vmem>>, vector<256x128xf32>
    tpu.vector_store %arg5[%c0, %c0_0], %0 {strides = array<i32>} : memref<256x128xf32, #tpu.memory_space<vmem>>, vector<256x128xf32>,
    %c0_1 = arith.constant 0 : index
    %c0_2 = arith.constant 0 : index
    %c0_3 = arith.constant 0 : index
    %c0_4 = arith.constant 0 : index
    %2 = vector.load %arg1[%c0_1, %c0_2, %c0_3, %c0_4] : memref<1x18x18x4xf32, #tpu.memory_space<vmem>>, vector<1x16x16x4xf32>
    %3 = vector.shape_cast %2 : vector<1x16x16x4xf32> to vector<16x16x4xf32>
    %4 = vector.shape_cast %3 : vector<16x16x4xf32> to vector<256x4xf32>
    %c0_5 = arith.constant 0 : index
    %c0_6 = arith.constant 0 : index
    %5 = vector.load %arg5[%c0_5, %c0_6] : memref<256x128xf32, #tpu.memory_space<vmem>>, vector<256x4xf32>
    tpu.vector_store %arg5[%c0_5, %c0_6], %4 {strides = array<i32>} : memref<256x128xf32, #tpu.memory_space<vmem>>, vector<256x4xf32>,
    %c0_7 = arith.constant 0 : index
    %c0_8 = arith.constant 0 : index
    %c1 = arith.constant 1 : index
    %c0_9 = arith.constant 0 : index
    %6 = vector.load %arg1[%c0_7, %c0_8, %c1, %c0_9] : memref<1x18x18x4xf32, #tpu.memory_space<vmem>>, vector<1x16x16x4xf32>
    %7 = vector.shape_cast %6 : vector<1x16x16x4xf32> to vector<16x16x4xf32>
    %8 = vector.shape_cast %7 : vector<16x16x4xf32> to vector<256x4xf32>
    %c0_10 = arith.constant 0 : index
    %c4 = arith.constant 4 : index
    %9 = vector.load %arg5[%c0_10, %c4] : memref<256x128xf32, #tpu.memory_space<vmem>>, vector<256x4xf32>
    tpu.vector_store %arg5[%c0_10, %c4], %8 {strides = array<i32>} : memref<256x128xf32, #tpu.memory_space<vmem>>, vector<256x4xf32>,
    %c0_11 = arith.constant 0 : index
    %c0_12 = arith.constant 0 : index
    %c2 = arith.constant 2 : index
    %c0_13 = arith.constant 0 : index
    %10 = vector.load %arg1[%c0_11, %c0_12, %c2, %c0_13] : memref<1x18x18x4xf32, #tpu.memory_space<vmem>>, vector<1x16x16x4xf32>
    %11 = vector.shape_cast %10 : vector<1x16x16x4xf32> to vector<16x16x4xf32>
    %12 = vector.shape_cast %11 : vector<16x16x4xf32> to vector<256x4xf32>
    %c0_14 = arith.constant 0 : index
    %c8 = arith.constant 8 : index
    %13 = vector.load %arg5[%c0_14, %c8] : memref<256x128xf32, #tpu.memory_space<vmem>>, vector<256x4xf32>
    tpu.vector_store %arg5[%c0_14, %c8], %12 {strides = array<i32>} : memref<256x128xf32, #tpu.memory_space<vmem>>, vector<256x4xf32>,
    %c0_15 = arith.constant 0 : index
    %c1_16 = arith.constant 1 : index
    %c0_17 = arith.constant 0 : index
    %c0_18 = arith.constant 0 : index
    %14 = vector.load %arg1[%c0_15, %c1_16, %c0_17, %c0_18] : memref<1x18x18x4xf32, #tpu.memory_space<vmem>>, vector<1x16x16x4xf32>
    %15 = vector.shape_cast %14 : vector<1x16x16x4xf32> to vector<16x16x4xf32>
    %16 = vector.shape_cast %15 : vector<16x16x4xf32> to vector<256x4xf32>
    %c0_19 = arith.constant 0 : index
    %c12 = arith.constant 12 : index
    %17 = vector.load %arg5[%c0_19, %c12] : memref<256x128xf32, #tpu.memory_space<vmem>>, vector<256x4xf32>
    tpu.vector_store %arg5[%c0_19, %c12], %16 {strides = array<i32>} : memref<256x128xf32, #tpu.memory_space<vmem>>, vector<256x4xf32>,
    %c0_20 = arith.constant 0 : index
    %c1_21 = arith.constant 1 : index
    %c1_22 = arith.constant 1 : index
    %c0_23 = arith.constant 0 : index
    %18 = vector.load %arg1[%c0_20, %c1_21, %c1_22, %c0_23] : memref<1x18x18x4xf32, #tpu.memory_space<vmem>>, vector<1x16x16x4xf32>
    %19 = vector.shape_cast %18 : vector<1x16x16x4xf32> to vector<16x16x4xf32>
    %20 = vector.shape_cast %19 : vector<16x16x4xf32> to vector<256x4xf32>
    %c0_24 = arith.constant 0 : index
    %c16 = arith.constant 16 : index
    %21 = vector.load %arg5[%c0_24, %c16] : memref<256x128xf32, #tpu.memory_space<vmem>>, vector<256x4xf32>
    tpu.vector_store %arg5[%c0_24, %c16], %20 {strides = array<i32>} : memref<256x128xf32, #tpu.memory_space<vmem>>, vector<256x4xf32>,
    %c0_25 = arith.constant 0 : index
    %c1_26 = arith.constant 1 : index
    %c2_27 = arith.constant 2 : index
    %c0_28 = arith.constant 0 : index
    %22 = vector.load %arg1[%c0_25, %c1_26, %c2_27, %c0_28] : memref<1x18x18x4xf32, #tpu.memory_space<vmem>>, vector<1x16x16x4xf32>
    %23 = vector.shape_cast %22 : vector<1x16x16x4xf32> to vector<16x16x4xf32>
    %24 = vector.shape_cast %23 : vector<16x16x4xf32> to vector<256x4xf32>
    %c0_29 = arith.constant 0 : index
    %c20 = arith.constant 20 : index
    %25 = vector.load %arg5[%c0_29, %c20] : memref<256x128xf32, #tpu.memory_space<vmem>>, vector<256x4xf32>
    tpu.vector_store %arg5[%c0_29, %c20], %24 {strides = array<i32>} : memref<256x128xf32, #tpu.memory_space<vmem>>, vector<256x4xf32>,
    %c0_30 = arith.constant 0 : index
    %c2_31 = arith.constant 2 : index
    %c0_32 = arith.constant 0 : index
    %c0_33 = arith.constant 0 : index
    %26 = vector.load %arg1[%c0_30, %c2_31, %c0_32, %c0_33] : memref<1x18x18x4xf32, #tpu.memory_space<vmem>>, vector<1x16x16x4xf32>
    %27 = vector.shape_cast %26 : vector<1x16x16x4xf32> to vector<16x16x4xf32>
    %28 = vector.shape_cast %27 : vector<16x16x4xf32> to vector<256x4xf32>
    %c0_34 = arith.constant 0 : index
    %c24 = arith.constant 24 : index
    %29 = vector.load %arg5[%c0_34, %c24] : memref<256x128xf32, #tpu.memory_space<vmem>>, vector<256x4xf32>
    tpu.vector_store %arg5[%c0_34, %c24], %28 {strides = array<i32>} : memref<256x128xf32, #tpu.memory_space<vmem>>, vector<256x4xf32>,
    %c0_35 = arith.constant 0 : index
    %c2_36 = arith.constant 2 : index
    %c1_37 = arith.constant 1 : index
    %c0_38 = arith.constant 0 : index
    %30 = vector.load %arg1[%c0_35, %c2_36, %c1_37, %c0_38] : memref<1x18x18x4xf32, #tpu.memory_space<vmem>>, vector<1x16x16x4xf32>
    %31 = vector.shape_cast %30 : vector<1x16x16x4xf32> to vector<16x16x4xf32>
    %32 = vector.shape_cast %31 : vector<16x16x4xf32> to vector<256x4xf32>
    %c0_39 = arith.constant 0 : index
    %c28 = arith.constant 28 : index
    %33 = vector.load %arg5[%c0_39, %c28] : memref<256x128xf32, #tpu.memory_space<vmem>>, vector<256x4xf32>
    tpu.vector_store %arg5[%c0_39, %c28], %32 {strides = array<i32>} : memref<256x128xf32, #tpu.memory_space<vmem>>, vector<256x4xf32>,
    %c0_40 = arith.constant 0 : index
    %c2_41 = arith.constant 2 : index
    %c2_42 = arith.constant 2 : index
    %c0_43 = arith.constant 0 : index
    %34 = vector.load %arg1[%c0_40, %c2_41, %c2_42, %c0_43] : memref<1x18x18x4xf32, #tpu.memory_space<vmem>>, vector<1x16x16x4xf32>
    %35 = vector.shape_cast %34 : vector<1x16x16x4xf32> to vector<16x16x4xf32>
    %36 = vector.shape_cast %35 : vector<16x16x4xf32> to vector<256x4xf32>
    %c0_44 = arith.constant 0 : index
    %c32 = arith.constant 32 : index
    %37 = vector.load %arg5[%c0_44, %c32] : memref<256x128xf32, #tpu.memory_space<vmem>>, vector<256x4xf32>
    tpu.vector_store %arg5[%c0_44, %c32], %36 {strides = array<i32>} : memref<256x128xf32, #tpu.memory_space<vmem>>, vector<256x4xf32>,
    %c0_45 = arith.constant 0 : index
    %c0_46 = arith.constant 0 : index
    %38 = vector.load %arg5[%c0_45, %c0_46] : memref<256x128xf32, #tpu.memory_space<vmem>>, vector<256x128xf32>
    %c0_47 = arith.constant 0 : index
    %c0_48 = arith.constant 0 : index
    %39 = vector.load %arg2[%c0_47, %c0_48] : memref<128x128xf32, #tpu.memory_space<vmem>>, vector<128x128xf32>
    %cst_49 = arith.constant dense<0.000000e+00> : vector<256x128xf32>
    %40 = tpu.matmul %38, %39, %cst_49 {dimension_numbers = #tpu.dot_dimension_numbers<[1], [0], [0], [1], [0, 0, 1, 1], [], []>} : vector<256x128xf32>, vector<128x128xf32>, vector<256x128xf32> -> vector<256x128xf32>
    %41 = vector.extract_strided_slice %40 {offsets = [0, 0], sizes = [256, 8], strides = [1, 1]} : vector<256x128xf32> to vector<256x8xf32>
    %c0_50 = arith.constant 0 : index
    %c0_51 = arith.constant 0 : index
    %42 = vector.load %arg3[%c0_50, %c0_51] : memref<1x8xf32, #tpu.memory_space<vmem>>, vector<1x8xf32>
    %43 = vector.broadcast %42 : vector<1x8xf32> to vector<256x8xf32>
    %44 = arith.addf %41, %43 : vector<256x8xf32>
    %cst_52 = arith.constant 0.000000e+00 : f32
    %45 = vector.broadcast %cst_52 : f32 to vector<256x8xf32>
    %46 = arith.maximumf %44, %45 : vector<256x8xf32>
    %c0_53 = arith.constant 0 : index
    %c0_54 = arith.constant 0 : index
    %47 = vector.load %arg4[%c0_53, %c0_54] : memref<256x8xf32, #tpu.memory_space<vmem>>, vector<256x8xf32>
    tpu.vector_store %arg4[%c0_53, %c0_54], %46 {strides = array<i32>} : memref<256x8xf32, #tpu.memory_space<vmem>>, vector<256x8xf32>,
    return
  }
  func.func @transform_0(%arg0: i32) -> (i32, i32, i32, i32) {
    %c0_i32 = arith.constant 0 : i32
    %c0_i32_0 = arith.constant 0 : i32
    %c0_i32_1 = arith.constant 0 : i32
    %c0_i32_2 = arith.constant 0 : i32
    return %arg0, %c0_i32, %c0_i32_0, %c0_i32_1 : i32, i32, i32, i32
  }
  func.func @transform_1(%arg0: i32) -> (i32, i32) {
    %c0_i32 = arith.constant 0 : i32
    %c0_i32_0 = arith.constant 0 : i32
    %c0_i32_1 = arith.constant 0 : i32
    return %c0_i32, %c0_i32_0 : i32, i32
  }
  func.func @transform_2(%arg0: i32) -> (i32, i32) {
    %c0_i32 = arith.constant 0 : i32
    %c0_i32_0 = arith.constant 0 : i32
    %c0_i32_1 = arith.constant 0 : i32
    return %c0_i32, %c0_i32_0 : i32, i32
  }
  func.func @transform_3(%arg0: i32) -> (i32, i32) {
    %c0_i32 = arith.constant 0 : i32
    %c0_i32_0 = arith.constant 0 : i32
    return %arg0, %c0_i32 : i32, i32
  }
}

</mosaic_0001>

<bundles_post_ra>
// kernel: conv2d_relu.1
= control target key start
LH: loop header
LB: loop body
LE: loop exit
PB: predicated region body
PF: predicated region fallthrough
CT: control target
= control target key end

     0   :  { %s2682_s12 = smov 0   ;;  %s3813_s0 = inlined_call_operand.vmem [shape: f32[2,18,18,4], index: 0, kind: input, shape index: {}]   ;;  %s3814_s1 = inlined_call_operand.vmem [shape: f32[128,128], index: 1, kind: input, shape index: {}]   ;;  %s3815_s2 = inlined_call_operand.vmem [shape: f32[1,8], index: 2, kind: input, shape index: {}]   ;;  %s3816_s3 = inlined_call_operand.vmem [shape: f32[512,8], index: 3, kind: output, shape index: {}]  }
   0x1 LB: > { %s2688_s13 = sadd.s32 4294967295, %s2651_s12   ;;  %p2252_p0 = scmp.ge.s32.totalorder %s2651_s12, 1  ;;  %s2651_s12 = sphi %s2682_s12, %s13_s12  }
   0x2   : > { %p137_p1 = scmp.lt.s32.totalorder %s2651_s12, 3 }
   0x4   : > { %p138_p2 = pnand %p2252_p0, %p137_p1 }
   0x5   : > { %p161_p3 = scmp.lt.s32.totalorder (!%p138_p2), %s2688_s13, 1  ;;  %v2653_v0 = vmov (!%p138_p2), 0.0   ;;  %s2654_s19 = smov (!%p138_p2), 4   ;;  %vm236_vm0 = vcmask (!%p138_p2), 31744   ;;  %vm429_vm1 = vcmask (!%p138_p2), 64544   ;;  %vm622_vm2 = vcmask (!%p138_p2), 97344  }
   0x6   : > { %141 = sbr.rel (%p138_p2) target bundleno = 869 (0x365), region = 32  ;;  %174 = vst [vmem:[#allocation2 + $0x10] sm:$0xff] (!%p138_p2), %v2653_v0  ;;  %172 = vst [vmem:[#allocation2] sm:$0xff] (!%p138_p2), %v2653_v0  ;;  %s2655_s20 = smov (!%p138_p2), 8   ;;  %vm816_vm3 = vcmask (!%p138_p2), 130144   ;;  %vm1009_vm4 = vcmask (!%p138_p2), 162944  }
   0x7   : > { %173 = vst [vmem:[#allocation2 + $0x8] sm:$0xff] (!%p138_p2), %v2653_v0  ;;  %175 = vst [vmem:[#allocation2 + $0x18] sm:$0xff] (!%p138_p2), %v2653_v0  ;;  %s2656_s21 = smov (!%p138_p2), 12   ;;  %s2657_s22 = smov (!%p138_p2), 16   ;;  %vm1202_vm5 = vcmask (!%p138_p2), 195744   ;;  %vm1396_vm6 = vcmask (!%p138_p2), 228544  }
   0x8   : > { %176 = vst [vmem:[#allocation2 + $0x20] sm:$0xff] (!%p138_p2), %v2653_v0  ;;  %177 = vst [vmem:[#allocation2 + $0x28] sm:$0xff] (!%p138_p2), %v2653_v0  ;;  %s2658_s23 = smov (!%p138_p2), 20   ;;  %s2659_s5 = smov (!%p138_p2), 24   ;;  %vm1589_vm7 = vcmask (!%p138_p2), 261344   ;;  %vm1782_vm8 = vcmask (!%p138_p2), 294144  }
   0x9   : > { %178 = vst [vmem:[#allocation2 + $0x30] sm:$0xff] (!%p138_p2), %v2653_v0  ;;  %179 = vst [vmem:[#allocation2 + $0x38] sm:$0xff] (!%p138_p2), %v2653_v0  ;;  %s2660_s16 = smov (!%p138_p2), 28   ;;  %s2661_s6 = smov (!%p138_p2), 32   ;;  %vm2159_vm9 = vcmask (!%p138_p2), 64512  }
   0xa   : > { %180 = vst [vmem:[#allocation2 + $0x40] sm:$0xff] (!%p138_p2), %v2653_v0  ;;  %181 = vst [vmem:[#allocation2 + $0x48] sm:$0xff] (!%p138_p2), %v2653_v0 }
   0xb   : > { %182 = vst [vmem:[#allocation2 + $0x50] sm:$0xff] (!%p138_p2), %v2653_v0  ;;  %183 = vst [vmem:[#allocation2 + $0x58] sm:$0xff] (!%p138_p2), %v2653_v0 }
   0xc   : > { %184 = vst [vmem:[#allocation2 + $0x60] sm:$0xff] (!%p138_p2), %v2653_v0  ;;  %185 = vst [vmem:[#allocation2 + $0x68] sm:$0xff] (!%p138_p2), %v2653_v0 }
   0xd   : > { %186 = vst [vmem:[#allocation2 + $0x70] sm:$0xff] %v2653_v0  ;;  %187 = vst [vmem:[#allocation2 + $0x78] sm:$0xff] %v2653_v0  ;;  %s162_s14 = scalar_select %p161_p3, %s2688_s13, 1 }
   0xe   : > { %188 = vst [vmem:[#allocation2 + $0x80] sm:$0xff] %v2653_v0  ;;  %189 = vst [vmem:[#allocation2 + $0x88] sm:$0xff] %v2653_v0 }
   0xf   : > { %190 = vst [vmem:[#allocation2 + $0x90] sm:$0xff] %v2653_v0  ;;  %191 = vst [vmem:[#allocation2 + $0x98] sm:$0xff] %v2653_v0  ;;  %s2627_s15 = smul.u32 432, %s162_s14 }
  0x10   : > { %192 = vst [vmem:[#allocation2 + $0xa0] sm:$0xff] %v2653_v0  ;;  %193 = vst [vmem:[#allocation2 + $0xa8] sm:$0xff] %v2653_v0 }
  0x11   : > { %194 = vst [vmem:[#allocation2 + $0xb0] sm:$0xff] %v2653_v0  ;;  %195 = vst [vmem:[#allocation2 + $0xb8] sm:$0xff] %v2653_v0  ;;  %s2699_s18 = scalar_lea.vmem %s3813_s0, %s2627_s15 }
  0x12   : > { %196 = vst [vmem:[#allocation2 + $0xc0] sm:$0xff] %v2653_v0  ;;  %197 = vst [vmem:[#allocation2 + $0xc8] sm:$0xff] %v2653_v0  ;;  %v2702_v1 = vld [vmem:[%s2699_s18 + $0x19] sm:$0xff]  ;;  %v269_v2 = vld [vmem:[%s2699_s18 + $0x1] sm:$0xff] }
  0x13   : > { %198 = vst [vmem:[#allocation2 + $0xd0] sm:$0xff] %v2653_v0  ;;  %199 = vst [vmem:[#allocation2 + $0xd8] sm:$0xff] %v2653_v0  ;;  %337 = vrot.lane.b32.xlu1 %v2702_v1, %s2654_s19  ;;  %333 = vrot.lane.b32.xlu0 %v269_v2, %s2654_s19  ;;  %v2709_v3 = vld [vmem:[%s2699_s18 + $0x21] sm:$0xff]  ;;  %v270_v4 = vld [vmem:[%s2699_s18 + $0x9] sm:$0xff] }
  0x14   : > { %200 = vst [vmem:[#allocation2 + $0xe0] sm:$0xff] %v2653_v0  ;;  %201 = vst [vmem:[#allocation2 + $0xe8] sm:$0xff] %v2653_v0  ;;  %v2716_v5 = vld [vmem:[%s2699_s18 + $0x39] sm:$0xff]  ;;  %v2719_v6 = vld [vmem:[%s2699_s18 + $0x31] sm:$0xff] }
  0x15   : > { %202 = vst [vmem:[#allocation2 + $0xf0] sm:$0xff] %v2653_v0  ;;  %203 = vst [vmem:[#allocation2 + $0xf8] sm:$0xff] %v2653_v0  ;;  %v276_v7 = vld [vmem:[%s2699_s18 + $0x51] sm:$0xff]  ;;  %v2727_v8 = vld [vmem:[%s2699_s18 + $0x49] sm:$0xff] }
  0x16   : > { %v278_v9 = vld [vmem:[%s2699_s18 + $0x69] sm:$0xff]  ;;  %v277_v10 = vld [vmem:[%s2699_s18 + $0x61] sm:$0xff]  ;;  %v279_v12 = vld [vmem:[%s2699_s18 + $0x79] sm:$0xff] }
  0x17   : > { %339 = vrot.lane.b32.xlu1 %v2709_v3, %s2654_s19  ;;  %335 = vrot.lane.b32.xlu0 %v270_v4, %s2654_s19  ;;  %v280_v11 = vld [vmem:[%s2699_s18 + $0x81] sm:$0xff]  ;;  %v2741_v13 = vld [vmem:[%s2699_s18 + $0x18] sm:$0xff] }
  0x18   : > { %v204_v14 = vld [vmem:[%s2699_s18] sm:$0xff]  ;;  %v281_v16 = vld [vmem:[%s2699_s18 + $0x91] sm:$0xff]  ;;  %239 = vst.msk [vmem:[#allocation2 + $0x10] sm:$0xff] %vm236_vm0, %v2741_v13  ;;  %v205_v18 = vld [vmem:[%s2699_s18 + $0x8] sm:$0xff] }
  0x19   : > { %v282_v15 = vld [vmem:[%s2699_s18 + $0x99] sm:$0xff]  ;;  %237 = vst.msk [vmem:[#allocation2] sm:$0xff] %vm236_vm0, %v204_v14  ;;  %v284_v19 = vld [vmem:[%s2699_s18 + $0xb1] sm:$0xff]  ;;  %238 = vst.msk [vmem:[#allocation2 + $0x8] sm:$0xff] %vm236_vm0, %v205_v18 }
  0x1a   : > { %v2750_v17 = vld [vmem:[%s2699_s18 + $0x20] sm:$0xff]  ;;  %v2758_v20 = vld [vmem:[%s2699_s18 + $0x38] sm:$0xff]  ;;  %v2761_v21 = vld [vmem:[%s2699_s18 + $0x30] sm:$0xff] }
  0x1b   : > { %343 = vrot.lane.b32.xlu1 %v2716_v5, %s2654_s19  ;;  %341 = vrot.lane.b32.xlu0 %v2719_v6, %s2654_s19  ;;  %240 = vst.msk [vmem:[#allocation2 + $0x18] sm:$0xff] %vm236_vm0, %v2750_v17  ;;  %v283_v22 = vld [vmem:[%s2699_s18 + $0xa9] sm:$0xff]  ;;  %242 = vst.msk [vmem:[#allocation2 + $0x28] sm:$0xff] %vm236_vm0, %v2758_v20  ;;  %v2782_v26 = vld [vmem:[%s2699_s18 + $0x60] sm:$0xff] }
  0x1c   : > { %241 = vst.msk [vmem:[#allocation2 + $0x20] sm:$0xff] %vm236_vm0, %v2761_v21  ;;  %v2771_v23 = vld [vmem:[%s2699_s18 + $0x50] sm:$0xff]  ;;  %v2776_v24 = vld [vmem:[%s2699_s18 + $0x48] sm:$0xff]  ;;  %245 = vst.msk [vmem:[#allocation2 + $0x40] sm:$0xff] %vm236_vm0, %v2782_v26 }
  0x1d   : > { %244 = vst.msk [vmem:[#allocation2 + $0x38] sm:$0xff] %vm236_vm0, %v2771_v23  ;;  %v2779_v25 = vld [vmem:[%s2699_s18 + $0x68] sm:$0xff]  ;;  %243 = vst.msk [vmem:[#allocation2 + $0x30] sm:$0xff] %vm236_vm0, %v2776_v24  ;;  %v2791_v27 = vld [vmem:[%s2699_s18 + $0x80] sm:$0xff] }
  0x1e   : > { %246 = vst.msk [vmem:[#allocation2 + $0x48] sm:$0xff] %vm236_vm0, %v2779_v25  ;;  %v2794_v28 = vld [vmem:[%s2699_s18 + $0x78] sm:$0xff]  ;;  %v286_v30 = vld [vmem:[%s2699_s18 + $0xc9] sm:$0xff]  ;;  %v285_v31 = vld [vmem:[%s2699_s18 + $0xc1] sm:$0xff] }
  0x1f   : > { %347 = vrot.lane.b32.xlu1 %v276_v7, %s2654_s19  ;;  %345 = vrot.lane.b32.xlu0 %v2727_v8, %s2654_s19  ;;  %v2797_v29 = vld [vmem:[%s2699_s18 + $0x98] sm:$0xff]  ;;  %248 = vst.msk [vmem:[#allocation2 + $0x58] sm:$0xff] %vm236_vm0, %v2791_v27  ;;  %247 = vst.msk [vmem:[#allocation2 + $0x50] sm:$0xff] %vm236_vm0, %v2794_v28  ;;  %v2808_v32 = vld [vmem:[%s2699_s18 + $0x90] sm:$0xff] }
  0x20   : > { %250 = vst.msk [vmem:[#allocation2 + $0x68] sm:$0xff] %vm236_vm0, %v2797_v29  ;;  %v2811_v33 = vld [vmem:[%s2699_s18 + $0xb0] sm:$0xff]  ;;  %v2814_v34 = vld [vmem:[%s2699_s18 + $0xa8] sm:$0xff]  ;;  %249 = vst.msk [vmem:[#allocation2 + $0x60] sm:$0xff] %vm236_vm0, %v2808_v32 }
  0x21   : > { %252 = vst.msk [vmem:[#allocation2 + $0x78] sm:$0xff] %vm236_vm0, %v2811_v33  ;;  %251 = vst.msk [vmem:[#allocation2 + $0x70] sm:$0xff] %vm236_vm0, %v2814_v34  ;;  %v2825_v35 = vld [vmem:[%s2699_s18 + $0xc8] sm:$0xff]  ;;  %v2828_v36 = vld [vmem:[%s2699_s18 + $0xc0] sm:$0xff] }
  0x22   : > { %254 = vst.msk [vmem:[#allocation2 + $0x88] sm:$0xff] %vm236_vm0, %v2825_v35  ;;  %253 = vst.msk [vmem:[#allocation2 + $0x80] sm:$0xff] %vm236_vm0, %v2828_v36  ;;  %v2835_v37 = vld [vmem:[%s2699_s18 + $0xe0] sm:$0xff]  ;;  %v2838_v38 = vld [vmem:[%s2699_s18 + $0xd8] sm:$0xff] }
  0x23   : > { %351 = vrot.lane.b32.xlu1 %v278_v9, %s2654_s19  ;;  %349 = vrot.lane.b32.xlu0 %v277_v10, %s2654_s19  ;;  %v2841_v39 = vld [vmem:[%s2699_s18 + $0xf8] sm:$0xff]  ;;  %256 = vst.msk [vmem:[#allocation2 + $0x98] sm:$0xff] %vm236_vm0, %v2835_v37  ;;  %255 = vst.msk [vmem:[#allocation2 + $0x90] sm:$0xff] %vm236_vm0, %v2838_v38  ;;  %v2850_v40 = vld [vmem:[%s2699_s18 + $0xf0] sm:$0xff] }
  0x24   : > { %258 = vst.msk [vmem:[#allocation2 + $0xa8] sm:$0xff] %vm236_vm0, %v2841_v39  ;;  %v2853_v41 = vld [vmem:[%s2699_s18 + $0x110] sm:$0xff]  ;;  %v2856_v42 = vld [vmem:[%s2699_s18 + $0x108] sm:$0xff]  ;;  %257 = vst.msk [vmem:[#allocation2 + $0xa0] sm:$0xff] %vm236_vm0, %v2850_v40 }
  0x25   : > { %260 = vst.msk [vmem:[#allocation2 + $0xb8] sm:$0xff] %vm236_vm0, %v2853_v41  ;;  %259 = vst.msk [vmem:[#allocation2 + $0xb0] sm:$0xff] %vm236_vm0, %v2856_v42  ;;  %v2867_v43 = vld [vmem:[%s2699_s18 + $0xe1] sm:$0xff]  ;;  %v2870_v44 = vld [vmem:[%s2699_s18 + $0xd9] sm:$0xff] }
  0x26   : > { %v2873_v45 = vld [vmem:[%s2699_s18 + $0x128] sm:$0xff]  ;;  %v2876_v46 = vld [vmem:[%s2699_s18 + $0x120] sm:$0xff]  ;;  %v2890_v48 = vld [vmem:[%s2699_s18 + $0xf1] sm:$0xff] }
  0x27   : > { %355 = vrot.lane.b32.xlu1 %v280_v11, %s2654_s19  ;;  %353 = vrot.lane.b32.xlu0 %v279_v12, %s2654_s19  ;;  %262 = vst.msk [vmem:[#allocation2 + $0xc8] sm:$0xff] %vm236_vm0, %v2873_v45  ;;  %261 = vst.msk [vmem:[#allocation2 + $0xc0] sm:$0xff] %vm236_vm0, %v2876_v46  ;;  %v2887_v47 = vld [vmem:[%s2699_s18 + $0xf9] sm:$0xff]  ;;  %v2907_v51 = vld [vmem:[%s2699_s18 + $0x111] sm:$0xff] }
  0x28   : > { %v2893_v49 = vld [vmem:[%s2699_s18 + $0x140] sm:$0xff]  ;;  %v2896_v50 = vld [vmem:[%s2699_s18 + $0x138] sm:$0xff]  ;;  %v2910_v52 = vld [vmem:[%s2699_s18 + $0x109] sm:$0xff] }
  0x29   : > { %264 = vst.msk [vmem:[#allocation2 + $0xd8] sm:$0xff] %vm236_vm0, %v2893_v49  ;;  %263 = vst.msk [vmem:[#allocation2 + $0xd0] sm:$0xff] %vm236_vm0, %v2896_v50  ;;  %v2913_v53 = vld [vmem:[%s2699_s18 + $0x158] sm:$0xff]  ;;  %v2916_v54 = vld [vmem:[%s2699_s18 + $0x150] sm:$0xff] }
  0x2a   : > { %266 = vst.msk [vmem:[#allocation2 + $0xe8] sm:$0xff] %vm236_vm0, %v2913_v53  ;;  %265 = vst.msk [vmem:[#allocation2 + $0xe0] sm:$0xff] %vm236_vm0, %v2916_v54  ;;  %v294_v55 = vld [vmem:[%s2699_s18 + $0x129] sm:$0xff]  ;;  %v293_v56 = vld [vmem:[%s2699_s18 + $0x121] sm:$0xff] }
  0x2b   : > { %359 = vrot.lane.b32.xlu1 %v282_v15, %s2654_s19  ;;  %357 = vrot.lane.b32.xlu0 %v281_v16, %s2654_s19  ;;  %v2929_v57 = vld [vmem:[%s2699_s18 + $0x170] sm:$0xff]  ;;  %v2932_v58 = vld [vmem:[%s2699_s18 + $0x168] sm:$0xff] }
  0x2c   : > { %268 = vst.msk [vmem:[#allocation2 + $0xf8] sm:$0xff] %vm236_vm0, %v2929_v57  ;;  %267 = vst.msk [vmem:[#allocation2 + $0xf0] sm:$0xff] %vm236_vm0, %v2932_v58  ;;  %v296_v59 = vld [vmem:[%s2699_s18 + $0x141] sm:$0xff]  ;;  %v295_v60 = vld [vmem:[%s2699_s18 + $0x139] sm:$0xff] }
  0x2d   : > { %v298_v61 = vld [vmem:[%s2699_s18 + $0x159] sm:$0xff]  ;;  %v297_v62 = vld [vmem:[%s2699_s18 + $0x151] sm:$0xff]  ;;  %v299_v0 = vld [vmem:[%s2699_s18 + $0x169] sm:$0xff] }
  0x2e   : > { %v300_v63 = vld [vmem:[%s2699_s18 + $0x171] sm:$0xff]  ;;  %v462_v4 = vld [vmem:[%s2699_s18 + $0x2] sm:$0xff]  ;;  %v2960_v9 = vld [vmem:[%s2699_s18 + $0x1a] sm:$0xff] }
  0x2f   : > { %363 = vrot.lane.b32.xlu1 %v284_v19, %s2654_s19  ;;  %361 = vrot.lane.b32.xlu0 %v283_v22, %s2654_s19  ;;  %v463_v2 = vld [vmem:[%s2699_s18 + $0xa] sm:$0xff]  ;;  %v2957_v7 = vld [vmem:[%s2699_s18 + $0x22] sm:$0xff] }
  0x30   : > { %v2967_v10 = vld [vmem:[%s2699_s18 + $0x3a] sm:$0xff]  ;;  %v2970_v11 = vld [vmem:[%s2699_s18 + $0x32] sm:$0xff]  ;;  %v2980_v14 = vld [vmem:[%s2699_s18 + $0x4a] sm:$0xff] }
  0x31   : > { %v2977_v12 = vld [vmem:[%s2699_s18 + $0x52] sm:$0xff]  ;;  %v471_v15 = vld [vmem:[%s2699_s18 + $0x6a] sm:$0xff]  ;;  %v470_v16 = vld [vmem:[%s2699_s18 + $0x62] sm:$0xff] }
  0x32   : > { %v473_v18 = vld [vmem:[%s2699_s18 + $0x82] sm:$0xff]  ;;  %v472_v19 = vld [vmem:[%s2699_s18 + $0x7a] sm:$0xff] }
  0x33   : > { %367 = vrot.lane.b32.xlu1 %v286_v30, %s2654_s19  ;;  %365 = vrot.lane.b32.xlu0 %v285_v31, %s2654_s19  ;;  %v475_v22 = vld [vmem:[%s2699_s18 + $0x9a] sm:$0xff]  ;;  %v474_v30 = vld [vmem:[%s2699_s18 + $0x92] sm:$0xff] }
  0x34   : > { %v477_v31 = vld [vmem:[%s2699_s18 + $0xb2] sm:$0xff] }
  0x37   : > { %371 = vrot.lane.b32.xlu1 %v2867_v43, %s2654_s19  ;;  %369 = vrot.lane.b32.xlu0 %v2870_v44, %s2654_s19 }
  0x3b   : > { %375 = vrot.lane.b32.xlu1 %v2887_v47, %s2654_s19  ;;  %373 = vrot.lane.b32.xlu0 %v2890_v48, %s2654_s19 }
  0x3f   : > { %379 = vrot.lane.b32.xlu1 %v2907_v51, %s2654_s19  ;;  %377 = vrot.lane.b32.xlu0 %v2910_v52, %s2654_s19 }
  0x43   : > { %383 = vrot.lane.b32.xlu1 %v294_v55, %s2654_s19  ;;  %381 = vrot.lane.b32.xlu0 %v293_v56, %s2654_s19  ;;  %v476_v55 = vld [vmem:[%s2699_s18 + $0xaa] sm:$0xff] }
  0x44   : > { %v479_v56 = vld [vmem:[%s2699_s18 + $0xca] sm:$0xff] }
  0x47   : > { %387 = vrot.lane.b32.xlu1 %v296_v59, %s2654_s19  ;;  %385 = vrot.lane.b32.xlu0 %v295_v60, %s2654_s19  ;;  %v478_v59 = vld [vmem:[%s2699_s18 + $0xc2] sm:$0xff] }
  0x48   : > { %v3007_v60 = vld [vmem:[%s2699_s18 + $0xe2] sm:$0xff] }
  0x4b   : > { %391 = vrot.lane.b32.xlu1 %v298_v61, %s2654_s19  ;;  %389 = vrot.lane.b32.xlu0 %v297_v62, %s2654_s19  ;;  %v3010_v61 = vld [vmem:[%s2699_s18 + $0xda] sm:$0xff] }
  0x4c   : > { %v3017_v62 = vld [vmem:[%s2699_s18 + $0xfa] sm:$0xff] }
  0x4f   : > { %395 = vrot.lane.b32.xlu1 %v300_v63, %s2654_s19  ;;  %393 = vrot.lane.b32.xlu0 %v299_v0, %s2654_s19  ;;  %v3020_v63 = vld [vmem:[%s2699_s18 + $0xf2] sm:$0xff] }
  0x50   : > { %v3027_v0 = vld [vmem:[%s2699_s18 + $0x112] sm:$0xff] }
  0x53   : > { %528 = vrot.lane.b32.xlu1 %v463_v2, %s2655_s20  ;;  %526 = vrot.lane.b32.xlu0 %v462_v4, %s2655_s20  ;;  %v3030_v2 = vld [vmem:[%s2699_s18 + $0x10a] sm:$0xff] }
  0x54   : > { %v487_v4 = vld [vmem:[%s2699_s18 + $0x12a] sm:$0xff] }
  0x57   : > { %532 = vrot.lane.b32.xlu1 %v2957_v7, %s2655_s20  ;;  %530 = vrot.lane.b32.xlu0 %v2960_v9, %s2655_s20 }
  0x5b   : > { %536 = vrot.lane.b32.xlu1 %v2967_v10, %s2655_s20  ;;  %534 = vrot.lane.b32.xlu0 %v2970_v11, %s2655_s20 }
  0x5f   : > { %540 = vrot.lane.b32.xlu1 %v2977_v12, %s2655_s20  ;;  %538 = vrot.lane.b32.xlu0 %v2980_v14, %s2655_s20 }
  0x63   : > { %544 = vrot.lane.b32.xlu1 %v471_v15, %s2655_s20  ;;  %542 = vrot.lane.b32.xlu0 %v470_v16, %s2655_s20  ;;  %v3038_v15 = vld [vmem:[%s2699_s18 + $0x122] sm:$0xff] }
  0x64   : > { %v489_v16 = vld [vmem:[%s2699_s18 + $0x142] sm:$0xff] }
  0x67   : > { %548 = vrot.lane.b32.xlu1 %v473_v18, %s2655_s20  ;;  %546 = vrot.lane.b32.xlu0 %v472_v19, %s2655_s20  ;;  %v488_v18 = vld [vmem:[%s2699_s18 + $0x13a] sm:$0xff] }
  0x6b   : > { %552 = vrot.lane.b32.xlu1 %v475_v22, %s2655_s20  ;;  %550 = vrot.lane.b32.xlu0 %v474_v30, %s2655_s20  ;;  %v491_v30 = vld [vmem:[%s2699_s18 + $0x15a] sm:$0xff] }
  0x6f   : > { %556 = vrot.lane.b32.xlu1 %v477_v31, %s2655_s20  ;;  %554 = vrot.lane.b32.xlu0 %v476_v55, %s2655_s20  ;;  %v490_v31 = vld [vmem:[%s2699_s18 + $0x152] sm:$0xff] }
  0x73   : > { %560 = vrot.lane.b32.xlu1 %v479_v56, %s2655_s20  ;;  %558 = vrot.lane.b32.xlu0 %v478_v59, %s2655_s20  ;;  %v493_v59 = vld [vmem:[%s2699_s18 + $0x172] sm:$0xff] }
  0x77   : > { %564 = vrot.lane.b32.xlu1 %v3007_v60, %s2655_s20  ;;  %562 = vrot.lane.b32.xlu0 %v3010_v61, %s2655_s20 }
  0x7b   : > { %568 = vrot.lane.b32.xlu1 %v3017_v62, %s2655_s20  ;;  %566 = vrot.lane.b32.xlu0 %v3020_v63, %s2655_s20 }
  0x7f   : > { %572 = vrot.lane.b32.xlu1 %v3027_v0, %s2655_s20  ;;  %570 = vrot.lane.b32.xlu0 %v3030_v2, %s2655_s20 }
  0x83   : > { %576 = vrot.lane.b32.xlu1 %v487_v4, %s2655_s20  ;;  %574 = vrot.lane.b32.xlu0 %v3038_v15, %s2655_s20  ;;  %v492_v4 = vld [vmem:[%s2699_s18 + $0x16a] sm:$0xff] }
  0x85   : > { %v338_v19 = vpop.permute.xlu1 %337  ;;  %v334_v22 = vpop.permute.xlu0 %333 }
  0x86   : > { %432 = vst.msk [vmem:[#allocation2 + $0x10] sm:$0xff] %vm429_vm1, %v338_v19  ;;  %430 = vst.msk [vmem:[#allocation2] sm:$0xff] %vm429_vm1, %v334_v22 }
  0x87   : > { %580 = vrot.lane.b32.xlu1 %v489_v16, %s2655_s20  ;;  %578 = vrot.lane.b32.xlu0 %v488_v18, %s2655_s20 }
  0x89   : > { %v340_v55 = vpop.permute.xlu1 %339  ;;  %v336_v56 = vpop.permute.xlu0 %335 }
  0x8a   : > { %433 = vst.msk [vmem:[#allocation2 + $0x18] sm:$0xff] %vm429_vm1, %v340_v55  ;;  %431 = vst.msk [vmem:[#allocation2 + $0x8] sm:$0xff] %vm429_vm1, %v336_v56 }
  0x8b   : > { %584 = vrot.lane.b32.xlu1 %v491_v30, %s2655_s20  ;;  %582 = vrot.lane.b32.xlu0 %v490_v31, %s2655_s20 }
  0x8d   : > { %v344_v19 = vpop.permute.xlu1 %343  ;;  %v342_v22 = vpop.permute.xlu0 %341 }
  0x8e   : > { %435 = vst.msk [vmem:[#allocation2 + $0x28] sm:$0xff] %vm429_vm1, %v344_v19  ;;  %434 = vst.msk [vmem:[#allocation2 + $0x20] sm:$0xff] %vm429_vm1, %v342_v22 }
  0x8f   : > { %588 = vrot.lane.b32.xlu1 %v493_v59, %s2655_s20  ;;  %586 = vrot.lane.b32.xlu0 %v492_v4, %s2655_s20 }
  0x91   : > { %v348_v16 = vpop.permute.xlu1 %347  ;;  %v346_v18 = vpop.permute.xlu0 %345 }
  0x92   : > { %437 = vst.msk [vmem:[#allocation2 + $0x38] sm:$0xff] %vm429_vm1, %v348_v16  ;;  %436 = vst.msk [vmem:[#allocation2 + $0x30] sm:$0xff] %vm429_vm1, %v346_v18 }
  0x93   : > { %722 = vrot.lane.b32.xlu1 %v2750_v17, %s2656_s21  ;;  %720 = vrot.lane.b32.xlu0 %v2741_v13, %s2656_s21 }
  0x95   : > { %v352_v30 = vpop.permute.xlu1 %351  ;;  %v350_v31 = vpop.permute.xlu0 %349 }
  0x96   : > { %439 = vst.msk [vmem:[#allocation2 + $0x48] sm:$0xff] %vm429_vm1, %v352_v30  ;;  %438 = vst.msk [vmem:[#allocation2 + $0x40] sm:$0xff] %vm429_vm1, %v350_v31 }
  0x97   : > { %726 = vrot.lane.b32.xlu1 %v2758_v20, %s2656_s21  ;;  %724 = vrot.lane.b32.xlu0 %v2761_v21, %s2656_s21 }
  0x99   : > { %v356_v55 = vpop.permute.xlu1 %355  ;;  %v354_v56 = vpop.permute.xlu0 %353 }
  0x9a   : > { %441 = vst.msk [vmem:[#allocation2 + $0x58] sm:$0xff] %vm429_vm1, %v356_v55  ;;  %440 = vst.msk [vmem:[#allocation2 + $0x50] sm:$0xff] %vm429_vm1, %v354_v56 }
  0x9b   : > { %730 = vrot.lane.b32.xlu1 %v2771_v23, %s2656_s21  ;;  %728 = vrot.lane.b32.xlu0 %v2776_v24, %s2656_s21 }
  0x9d   : > { %v360_v13 = vpop.permute.xlu1 %359  ;;  %v358_v17 = vpop.permute.xlu0 %357 }
  0x9e   : > { %443 = vst.msk [vmem:[#allocation2 + $0x68] sm:$0xff] %vm429_vm1, %v360_v13  ;;  %442 = vst.msk [vmem:[#allocation2 + $0x60] sm:$0xff] %vm429_vm1, %v358_v17 }
  0x9f   : > { %734 = vrot.lane.b32.xlu1 %v2779_v25, %s2656_s21  ;;  %732 = vrot.lane.b32.xlu0 %v2782_v26, %s2656_s21 }
  0xa1   : > { %v364_v59 = vpop.permute.xlu1 %363  ;;  %v362_v4 = vpop.permute.xlu0 %361 }
  0xa2   : > { %445 = vst.msk [vmem:[#allocation2 + $0x78] sm:$0xff] %vm429_vm1, %v364_v59  ;;  %444 = vst.msk [vmem:[#allocation2 + $0x70] sm:$0xff] %vm429_vm1, %v362_v4 }
  0xa3   : > { %738 = vrot.lane.b32.xlu1 %v2791_v27, %s2656_s21  ;;  %736 = vrot.lane.b32.xlu0 %v2794_v28, %s2656_s21 }
  0xa5   : > { %v368_v19 = vpop.permute.xlu1 %367  ;;  %v366_v22 = vpop.permute.xlu0 %365 }
  0xa6   : > { %447 = vst.msk [vmem:[#allocation2 + $0x88] sm:$0xff] %vm429_vm1, %v368_v19  ;;  %446 = vst.msk [vmem:[#allocation2 + $0x80] sm:$0xff] %vm429_vm1, %v366_v22  ;;  %v2287_v19 = vld [vmem:[%s2699_s18 + $0x188] sm:$0xff]  ;;  %v2286_v22 = vld [vmem:[%s2699_s18 + $0x180] sm:$0xff] }
  0xa7   : > { %742 = vrot.lane.b32.xlu1 %v2797_v29, %s2656_s21  ;;  %740 = vrot.lane.b32.xlu0 %v2808_v32, %s2656_s21 }
  0xa9   : > { %v372_v16 = vpop.permute.xlu1 %371  ;;  %v370_v18 = vpop.permute.xlu0 %369 }
  0xaa   : > { %449 = vst.msk [vmem:[#allocation2 + $0x98] sm:$0xff] %vm429_vm1, %v372_v16  ;;  %448 = vst.msk [vmem:[#allocation2 + $0x90] sm:$0xff] %vm429_vm1, %v370_v18 }
  0xab   : > { %746 = vrot.lane.b32.xlu1 %v2811_v33, %s2656_s21  ;;  %744 = vrot.lane.b32.xlu0 %v2814_v34, %s2656_s21 }
  0xad   : > { %v376_v30 = vpop.permute.xlu1 %375  ;;  %v374_v31 = vpop.permute.xlu0 %373 }
  0xae   : > { %451 = vst.msk [vmem:[#allocation2 + $0xa8] sm:$0xff] %vm429_vm1, %v376_v30  ;;  %450 = vst.msk [vmem:[#allocation2 + $0xa0] sm:$0xff] %vm429_vm1, %v374_v31 }
  0xaf   : > { %750 = vrot.lane.b32.xlu1 %v2825_v35, %s2656_s21  ;;  %748 = vrot.lane.b32.xlu0 %v2828_v36, %s2656_s21 }
  0xb1   : > { %v380_v29 = vpop.permute.xlu1 %379  ;;  %v378_v32 = vpop.permute.xlu0 %377 }
  0xb2   : > { %453 = vst.msk [vmem:[#allocation2 + $0xb8] sm:$0xff] %vm429_vm1, %v380_v29  ;;  %452 = vst.msk [vmem:[#allocation2 + $0xb0] sm:$0xff] %vm429_vm1, %v378_v32 }
  0xb3   : > { %754 = vrot.lane.b32.xlu1 %v2835_v37, %s2656_s21  ;;  %752 = vrot.lane.b32.xlu0 %v2838_v38, %s2656_s21 }
  0xb5   : > { %v384_v33 = vpop.permute.xlu1 %383  ;;  %v382_v34 = vpop.permute.xlu0 %381 }
  0xb6   : > { %455 = vst.msk [vmem:[#allocation2 + $0xc8] sm:$0xff] %vm429_vm1, %v384_v33  ;;  %454 = vst.msk [vmem:[#allocation2 + $0xc0] sm:$0xff] %vm429_vm1, %v382_v34 }
  0xb7   : > { %758 = vrot.lane.b32.xlu1 %v2841_v39, %s2656_s21  ;;  %756 = vrot.lane.b32.xlu0 %v2850_v40, %s2656_s21 }
  0xb9   : > { %v388_v35 = vpop.permute.xlu1 %387  ;;  %v386_v36 = vpop.permute.xlu0 %385 }
  0xba   : > { %457 = vst.msk [vmem:[#allocation2 + $0xd8] sm:$0xff] %vm429_vm1, %v388_v35  ;;  %456 = vst.msk [vmem:[#allocation2 + $0xd0] sm:$0xff] %vm429_vm1, %v386_v36 }
  0xbb   : > { %762 = vrot.lane.b32.xlu1 %v2853_v41, %s2656_s21  ;;  %760 = vrot.lane.b32.xlu0 %v2856_v42, %s2656_s21 }
  0xbd   : > { %v392_v37 = vpop.permute.xlu1 %391  ;;  %v390_v38 = vpop.permute.xlu0 %389 }
  0xbe   : > { %459 = vst.msk [vmem:[#allocation2 + $0xe8] sm:$0xff] %vm429_vm1, %v392_v37  ;;  %458 = vst.msk [vmem:[#allocation2 + $0xe0] sm:$0xff] %vm429_vm1, %v390_v38 }
  0xbf   : > { %766 = vrot.lane.b32.xlu1 %v2873_v45, %s2656_s21  ;;  %764 = vrot.lane.b32.xlu0 %v2876_v46, %s2656_s21 }
  0xc1   : > { %v396_v55 = vpop.permute.xlu1 %395  ;;  %v394_v56 = vpop.permute.xlu0 %393 }
  0xc2   : > { %461 = vst.msk [vmem:[#allocation2 + $0xf8] sm:$0xff] %vm429_vm1, %v396_v55  ;;  %460 = vst.msk [vmem:[#allocation2 + $0xf0] sm:$0xff] %vm429_vm1, %v394_v56 }
  0xc3   : > { %770 = vrot.lane.b32.xlu1 %v2893_v49, %s2656_s21  ;;  %768 = vrot.lane.b32.xlu0 %v2896_v50, %s2656_s21 }
  0xc5   : > { %v529_v13 = vpop.permute.xlu1 %528  ;;  %v527_v17 = vpop.permute.xlu0 %526 }
  0xc6   : > { %624 = vst.msk [vmem:[#allocation2 + $0x8] sm:$0xff] %vm622_vm2, %v529_v13  ;;  %623 = vst.msk [vmem:[#allocation2] sm:$0xff] %vm622_vm2, %v527_v17 }
  0xc7   : > { %774 = vrot.lane.b32.xlu1 %v2913_v53, %s2656_s21  ;;  %772 = vrot.lane.b32.xlu0 %v2916_v54, %s2656_s21 }
  0xc9   : > { %v533_v59 = vpop.permute.xlu1 %532  ;;  %v531_v4 = vpop.permute.xlu0 %530 }
  0xca   : > { %626 = vst.msk [vmem:[#allocation2 + $0x18] sm:$0xff] %vm622_vm2, %v533_v59  ;;  %625 = vst.msk [vmem:[#allocation2 + $0x10] sm:$0xff] %vm622_vm2, %v531_v4 }
  0xcb   : > { %778 = vrot.lane.b32.xlu1 %v2929_v57, %s2656_s21  ;;  %776 = vrot.lane.b32.xlu0 %v2932_v58, %s2656_s21 }
  0xcd   : > { %v537_v16 = vpop.permute.xlu1 %536  ;;  %v535_v18 = vpop.permute.xlu0 %534 }
  0xce   : > { %628 = vst.msk [vmem:[#allocation2 + $0x28] sm:$0xff] %vm622_vm2, %v537_v16  ;;  %627 = vst.msk [vmem:[#allocation2 + $0x20] sm:$0xff] %vm622_vm2, %v535_v18  ;;  %v1858_v16 = vld [vmem:[%s3814_s1 + $0x58] sm:$0xff] }
  0xcf   : > { %782 = vrot.lane.b32.xlu1 %v2287_v19, %s2656_s21  ;;  %780 = vrot.lane.b32.xlu0 %v2286_v22, %s2656_s21  ;;  %v1857_v22 = vld [vmem:[%s3814_s1 + $0x50] sm:$0xff] }
  0xd0   : > { %v2599_v18 = vpack.c.bf16 %v1858_v16, %v1857_v22 }
  0xd1   : > { %v541_v30 = vpop.permute.xlu1 %540  ;;  %v539_v31 = vpop.permute.xlu0 %538 }
  0xd2   : > { %630 = vst.msk [vmem:[#allocation2 + $0x38] sm:$0xff] %vm622_vm2, %v541_v30  ;;  %629 = vst.msk [vmem:[#allocation2 + $0x30] sm:$0xff] %vm622_vm2, %v539_v31 }
  0xd3   : > { %915 = vrot.lane.b32.xlu1 %v2709_v3, %s2657_s22  ;;  %913 = vrot.lane.b32.xlu0 %v2702_v1, %s2657_s22  ;;  %v1847_v1 = vld [vmem:[%s3814_s1] sm:$0xff]  ;;  %v1848_v3 = vld [vmem:[%s3814_s1 + $0x8] sm:$0xff] }
  0xd5   : > { %v545_v57 = vpop.permute.xlu1 %544  ;;  %v543_v58 = vpop.permute.xlu0 %542 }
  0xd6   : > { %632 = vst.msk [vmem:[#allocation2 + $0x48] sm:$0xff] %vm622_vm2, %v545_v57  ;;  %631 = vst.msk [vmem:[#allocation2 + $0x40] sm:$0xff] %vm622_vm2, %v543_v58 }
  0xd7   : > { %947 = vrot.lane.b32.xlu1 %v2867_v43, %s2657_s22  ;;  %945 = vrot.lane.b32.xlu0 %v2870_v44, %s2657_s22  ;;  %v2579_v43 = vpack.c.bf16 %v1848_v3, %v1847_v1  ;;  %v1862_v1 = vld [vmem:[%s3814_s1 + $0x78] sm:$0xff] }
  0xd9   : > { %v549_v29 = vpop.permute.xlu1 %548  ;;  %v547_v32 = vpop.permute.xlu0 %546  ;;  %2580 = vmatprep.subr.bf16.mxu0 %v2579_v43  ;;  %2611 = vmatprep.subr.bf16.mxu1 %v2579_v43 }
  0xda   : > { %634 = vst.msk [vmem:[#allocation2 + $0x58] sm:$0xff] %vm622_vm2, %v549_v29  ;;  %633 = vst.msk [vmem:[#allocation2 + $0x50] sm:$0xff] %vm622_vm2, %v547_v32  ;;  %2582 = vmatpush3.bf16.msra.mxu0 %v2579_v43  ;;  %2619 = vmatpush3.bf16.msra.mxu1 %v2579_v43  ;;  %v1861_v32 = vld [vmem:[%s3814_s1 + $0x70] sm:$0xff] }
  0xdb   : > { %1138 = vrot.lane.b32.xlu1 %v3010_v61, %s2658_s23  ;;  %1106 = vrot.lane.b32.xlu0 %v2960_v9, %s2658_s23  ;;  %v1849_v9 = vld [vmem:[%s3814_s1 + $0x10] sm:$0xff]  ;;  %v1850_v61 = vld [vmem:[%s3814_s1 + $0x18] sm:$0xff]  ;;  %v2607_v3 = vpack.c.bf16 %v1862_v1, %v1861_v32 }
  0xdc   : > { %v2583_v34 = vpack.c.bf16 %v1850_v61, %v1849_v9 }
  0xdd   : > { %v553_v44 = vpop.permute.xlu1 %552  ;;  %v551_v33 = vpop.permute.xlu0 %550 }
  0xde   : > { %636 = vst.msk [vmem:[#allocation2 + $0x68] sm:$0xff] %vm622_vm2, %v553_v44  ;;  %635 = vst.msk [vmem:[#allocation2 + $0x60] sm:$0xff] %vm622_vm2, %v551_v33  ;;  %2584 = vmatprep.subr.bf16.mxu0 %v2583_v34  ;;  %2612 = vmatprep.subr.bf16.mxu1 %v2583_v34 }
  0xdf   : > { %1140 = vrot.lane.b32.xlu1 %v3007_v60, %s2658_s23  ;;  %1108 = vrot.lane.b32.xlu0 %v2957_v7, %s2658_s23  ;;  %v1851_v7 = vld [vmem:[%s3814_s1 + $0x20] sm:$0xff]  ;;  %v1852_v60 = vld [vmem:[%s3814_s1 + $0x28] sm:$0xff] }
  0xe0   : > { %2586 = vmatpush3.bf16.msra.mxu0 %v2583_v34  ;;  %2620 = vmatpush3.bf16.msra.mxu1 %v2583_v34  ;;  %v2587_v37 = vpack.c.bf16 %v1852_v60, %v1851_v7 }
  0xe1   : > { %v557_v35 = vpop.permute.xlu1 %556  ;;  %v555_v36 = vpop.permute.xlu0 %554 }
  0xe2   : > { %638 = vst.msk [vmem:[#allocation2 + $0x78] sm:$0xff] %vm622_vm2, %v557_v35  ;;  %637 = vst.msk [vmem:[#allocation2 + $0x70] sm:$0xff] %vm622_vm2, %v555_v36  ;;  %2588 = vmatprep.subr.bf16.mxu0 %v2587_v37  ;;  %2613 = vmatprep.subr.bf16.mxu1 %v2587_v37 }
  0xe3   : > { %1332 = vrot.lane.b32.xlu1 %v2850_v40, %s2659_s5  ;;  %1300 = vrot.lane.b32.xlu0 %v2761_v21, %s2659_s5  ;;  %v1853_v21 = vld [vmem:[%s3814_s1 + $0x30] sm:$0xff]  ;;  %v1854_v40 = vld [vmem:[%s3814_s1 + $0x38] sm:$0xff] }
  0xe4   : > { %2590 = vmatpush3.bf16.msra.mxu0 %v2587_v37  ;;  %2621 = vmatpush3.bf16.msra.mxu1 %v2587_v37  ;;  %v2591_v56 = vpack.c.bf16 %v1854_v40, %v1853_v21 }
  0xe5   : > { %v561_v38 = vpop.permute.xlu1 %560  ;;  %v559_v55 = vpop.permute.xlu0 %558 }
  0xe6   : > { %640 = vst.msk [vmem:[#allocation2 + $0x88] sm:$0xff] %vm622_vm2, %v561_v38  ;;  %639 = vst.msk [vmem:[#allocation2 + $0x80] sm:$0xff] %vm622_vm2, %v559_v55  ;;  %2592 = vmatprep.subr.bf16.mxu0 %v2591_v56  ;;  %2614 = vmatprep.subr.bf16.mxu1 %v2591_v56 }
  0xe7   : > { %1334 = vrot.lane.b32.xlu1 %v2841_v39, %s2659_s5  ;;  %1302 = vrot.lane.b32.xlu0 %v2758_v20, %s2659_s5  ;;  %v1855_v20 = vld [vmem:[%s3814_s1 + $0x40] sm:$0xff]  ;;  %v1856_v39 = vld [vmem:[%s3814_s1 + $0x48] sm:$0xff] }
  0xe8   : > { %2594 = vmatpush3.bf16.msra.mxu0 %v2591_v56  ;;  %2622 = vmatpush3.bf16.msra.mxu1 %v2591_v56  ;;  %v2595_v59 = vpack.c.bf16 %v1856_v39, %v1855_v20  ;;  %v2389_v39 = vld [vmem:[%s2699_s18 + $0x69] sm:$0xff] }
  0xe9   : > { %v565_v13 = vpop.permute.xlu1 %564  ;;  %v563_v17 = vpop.permute.xlu0 %562 }
  0xea   : > { %642 = vst.msk [vmem:[#allocation2 + $0x98] sm:$0xff] %vm622_vm2, %v565_v13  ;;  %641 = vst.msk [vmem:[#allocation2 + $0x90] sm:$0xff] %vm622_vm2, %v563_v17  ;;  %2596 = vmatprep.subr.bf16.mxu0 %v2595_v59  ;;  %2615 = vmatprep.subr.bf16.mxu1 %v2595_v59 }
  0xeb   : > { %1525 = vrot.lane.b32.xlu1 %v2890_v48, %s2660_s16  ;;  %1493 = vrot.lane.b32.xlu0 %v2719_v6, %s2660_s16 }
  0xec   : > { %2598 = vmatpush3.bf16.msra.mxu0 %v2595_v59  ;;  %2623 = vmatpush3.bf16.msra.mxu1 %v2595_v59 }
  0xed   : > { %v569_v4 = vpop.permute.xlu1 %568  ;;  %v567_v19 = vpop.permute.xlu0 %566  ;;  %2600 = vmatprep.subr.bf16.mxu0 %v2599_v18  ;;  %2616 = vmatprep.subr.bf16.mxu1 %v2599_v18 }
  0xee   : > { %644 = vst.msk [vmem:[#allocation2 + $0xa8] sm:$0xff] %vm622_vm2, %v569_v4  ;;  %643 = vst.msk [vmem:[#allocation2 + $0xa0] sm:$0xff] %vm622_vm2, %v567_v19  ;;  %v2420_v19 = vld [vmem:[%s2699_s18 + $0x62] sm:$0xff] }
  0xef   : > { %949 = vrot.lane.b32.xlu1 %v2890_v48, %s2657_s22  ;;  %917 = vrot.lane.b32.xlu0 %v2719_v6, %s2657_s22  ;;  %v1859_v6 = vld [vmem:[%s3814_s1 + $0x60] sm:$0xff]  ;;  %v1860_v48 = vld [vmem:[%s3814_s1 + $0x68] sm:$0xff] }
  0xf0   : > { %2602 = vmatpush3.bf16.msra.mxu0 %v2599_v18  ;;  %2624 = vmatpush3.bf16.msra.mxu1 %v2599_v18  ;;  %v2603_v57 = vpack.c.bf16 %v1860_v48, %v1859_v6 }
  0xf1   : > { %v573_v30 = vpop.permute.xlu1 %572  ;;  %v571_v31 = vpop.permute.xlu0 %570 }
  0xf2   : > { %646 = vst.msk [vmem:[#allocation2 + $0xb8] sm:$0xff] %vm622_vm2, %v573_v30  ;;  %645 = vst.msk [vmem:[#allocation2 + $0xb0] sm:$0xff] %vm622_vm2, %v571_v31  ;;  %2604 = vmatprep.subr.bf16.mxu0 %v2603_v57  ;;  %2617 = vmatprep.subr.bf16.mxu1 %v2603_v57  ;;  %v2342_v31 = vld [vmem:[%s2699_s18 + $0x122] sm:$0xff] }
  0xf3   : > { %1527 = vrot.lane.b32.xlu1 %v2887_v47, %s2660_s16  ;;  %1495 = vrot.lane.b32.xlu0 %v2716_v5, %s2660_s16 }
  0xf4   : > { %2606 = vmatpush3.bf16.msra.mxu0 %v2603_v57  ;;  %2625 = vmatpush3.bf16.msra.mxu1 %v2603_v57  ;;  %v2421_v57 = vld [vmem:[%s2699_s18 + $0x6a] sm:$0xff] }
  0xf5   : > { %v577_v58 = vpop.permute.xlu1 %576  ;;  %v575_v29 = vpop.permute.xlu0 %574  ;;  %2608 = vmatprep.subr.bf16.mxu0 %v2607_v3  ;;  %2618 = vmatprep.subr.bf16.mxu1 %v2607_v3 }
  0xf6   : > { %648 = vst.msk [vmem:[#allocation2 + $0xc8] sm:$0xff] %vm622_vm2, %v577_v58  ;;  %647 = vst.msk [vmem:[#allocation2 + $0xc0] sm:$0xff] %vm622_vm2, %v575_v29 }
  0xf7   : > { %1718 = vrot.lane.b32.xlu1 %v3020_v63, %s2661_s6  ;;  %1686 = vrot.lane.b32.xlu0 %v2970_v11, %s2661_s6 }
  0xf8   : > { %2610 = vmatpush3.bf16.msra.mxu0 %v2607_v3  ;;  %2626 = vmatpush3.bf16.msra.mxu1 %v2607_v3 }
  0xf9   : > { %v581_v43 = vpop.permute.xlu1 %580  ;;  %v579_v44 = vpop.permute.xlu0 %578 }
  0xfa   : > { %650 = vst.msk [vmem:[#allocation2 + $0xd8] sm:$0xff] %vm622_vm2, %v581_v43  ;;  %649 = vst.msk [vmem:[#allocation2 + $0xd0] sm:$0xff] %vm622_vm2, %v579_v44 }
  0xfb   : > { %951 = vrot.lane.b32.xlu1 %v2887_v47, %s2657_s22  ;;  %919 = vrot.lane.b32.xlu0 %v2716_v5, %s2657_s22 }
  0xfd   : > { %v585_v33 = vpop.permute.xlu1 %584  ;;  %v583_v9 = vpop.permute.xlu0 %582 }
  0xfe   : > { %652 = vst.msk [vmem:[#allocation2 + $0xe8] sm:$0xff] %vm622_vm2, %v585_v33  ;;  %651 = vst.msk [vmem:[#allocation2 + $0xe0] sm:$0xff] %vm622_vm2, %v583_v9  ;;  %v2406_v9 = vld [vmem:[%s2699_s18 + $0x139] sm:$0xff] }
  0xff   : > { %1142 = vrot.lane.b32.xlu1 %v3020_v63, %s2658_s23  ;;  %1110 = vrot.lane.b32.xlu0 %v2970_v11, %s2658_s23 }
 0x101   : > { %v589_v61 = vpop.permute.xlu1 %588  ;;  %v587_v34 = vpop.permute.xlu0 %586 }
 0x102   : > { %654 = vst.msk [vmem:[#allocation2 + $0xf8] sm:$0xff] %vm622_vm2, %v589_v61  ;;  %653 = vst.msk [vmem:[#allocation2 + $0xf0] sm:$0xff] %vm622_vm2, %v587_v34 }
 0x103   : > { %1720 = vrot.lane.b32.xlu1 %v3017_v62, %s2661_s6  ;;  %1688 = vrot.lane.b32.xlu0 %v2967_v10, %s2661_s6 }
 0x105   : > { %v723_v5 = vpop.permute.xlu1 %722  ;;  %v721_v47 = vpop.permute.xlu0 %720 }
 0x106   : > { %818 = vst.msk [vmem:[#allocation2 + $0x8] sm:$0xff] %vm816_vm3, %v723_v5  ;;  %817 = vst.msk [vmem:[#allocation2] sm:$0xff] %vm816_vm3, %v721_v47  ;;  %v2391_v5 = vld [vmem:[%s2699_s18 + $0x81] sm:$0xff] }
 0x107   : > { %1144 = vrot.lane.b32.xlu1 %v3017_v62, %s2658_s23  ;;  %1112 = vrot.lane.b32.xlu0 %v2967_v10, %s2658_s23 }
 0x109   : > { %v727_v11 = vpop.permute.xlu1 %726  ;;  %v725_v63 = vpop.permute.xlu0 %724 }
 0x10a   : > { %820 = vst.msk [vmem:[#allocation2 + $0x18] sm:$0xff] %vm816_vm3, %v727_v11  ;;  %819 = vst.msk [vmem:[#allocation2 + $0x10] sm:$0xff] %vm816_vm3, %v725_v63  ;;  %v2438_v63 = vld [vmem:[%s2699_s18 + $0x13a] sm:$0xff] }
 0x10b   : > { %1336 = vrot.lane.b32.xlu1 %v2856_v42, %s2659_s5  ;;  %1304 = vrot.lane.b32.xlu0 %v2776_v24, %s2659_s5 }
 0x10d   : > { %v731_v35 = vpop.permute.xlu1 %730  ;;  %v729_v36 = vpop.permute.xlu0 %728 }
 0x10e   : > { %822 = vst.msk [vmem:[#allocation2 + $0x28] sm:$0xff] %vm816_vm3, %v731_v35  ;;  %821 = vst.msk [vmem:[#allocation2 + $0x20] sm:$0xff] %vm816_vm3, %v729_v36  ;;  %v2422_v35 = vld [vmem:[%s2699_s18 + $0x7a] sm:$0xff] }
 0x10f   : > { %1338 = vrot.lane.b32.xlu1 %v2853_v41, %s2659_s5  ;;  %1306 = vrot.lane.b32.xlu0 %v2771_v23, %s2659_s5  ;;  %v2387_v23 = vld [vmem:[%s2699_s18 + $0x51] sm:$0xff] }
 0x111   : > { %v735_v10 = vpop.permute.xlu1 %734  ;;  %v733_v62 = vpop.permute.xlu0 %732 }
 0x112   : > { %824 = vst.msk [vmem:[#allocation2 + $0x38] sm:$0xff] %vm816_vm3, %v735_v10  ;;  %823 = vst.msk [vmem:[#allocation2 + $0x30] sm:$0xff] %vm816_vm3, %v733_v62 }
 0x113   : > { %1529 = vrot.lane.b32.xlu1 %v2910_v52, %s2660_s16  ;;  %1497 = vrot.lane.b32.xlu0 %v2727_v8, %s2660_s16 }
 0x115   : > { %v739_v24 = vpop.permute.xlu1 %738  ;;  %v737_v42 = vpop.permute.xlu0 %736 }
 0x116   : > { %826 = vst.msk [vmem:[#allocation2 + $0x48] sm:$0xff] %vm816_vm3, %v739_v24  ;;  %825 = vst.msk [vmem:[#allocation2 + $0x40] sm:$0xff] %vm816_vm3, %v737_v42 }
 0x117   : > { %953 = vrot.lane.b32.xlu1 %v2910_v52, %s2657_s22  ;;  %921 = vrot.lane.b32.xlu0 %v2727_v8, %s2657_s22 }
 0x119   : > { %v743_v41 = vpop.permute.xlu1 %742  ;;  %v741_v7 = vpop.permute.xlu0 %740 }
 0x11a   : > { %828 = vst.msk [vmem:[#allocation2 + $0x58] sm:$0xff] %vm816_vm3, %v743_v41  ;;  %827 = vst.msk [vmem:[#allocation2 + $0x50] sm:$0xff] %vm816_vm3, %v741_v7 }
 0x11b   : > { %1531 = vrot.lane.b32.xlu1 %v2907_v51, %s2660_s16  ;;  %1499 = vrot.lane.b32.xlu0 %v2387_v23, %s2660_s16 }
 0x11d   : > { %v747_v60 = vpop.permute.xlu1 %746  ;;  %v745_v37 = vpop.permute.xlu0 %744 }
 0x11e   : > { %830 = vst.msk [vmem:[#allocation2 + $0x68] sm:$0xff] %vm816_vm3, %v747_v60  ;;  %829 = vst.msk [vmem:[#allocation2 + $0x60] sm:$0xff] %vm816_vm3, %v745_v37  ;;  %v2439_v60 = vld [vmem:[%s2699_s18 + $0x142] sm:$0xff] }
 0x11f   : > { %1722 = vrot.lane.b32.xlu1 %v3030_v2, %s2661_s6  ;;  %1690 = vrot.lane.b32.xlu0 %v2980_v14, %s2661_s6  ;;  %v2423_v37 = vld [vmem:[%s2699_s18 + $0x82] sm:$0xff] }
 0x121   : > { %v751_v8 = vpop.permute.xlu1 %750  ;;  %v749_v52 = vpop.permute.xlu0 %748 }
 0x122   : > { %832 = vst.msk [vmem:[#allocation2 + $0x78] sm:$0xff] %vm816_vm3, %v751_v8  ;;  %831 = vst.msk [vmem:[#allocation2 + $0x70] sm:$0xff] %vm816_vm3, %v749_v52 }
 0x123   : > { %955 = vrot.lane.b32.xlu1 %v2907_v51, %s2657_s22  ;;  %923 = vrot.lane.b32.xlu0 %v2387_v23, %s2657_s22 }
 0x125   : > { %v755_v38 = vpop.permute.xlu1 %754  ;;  %v753_v55 = vpop.permute.xlu0 %752 }
 0x126   : > { %834 = vst.msk [vmem:[#allocation2 + $0x88] sm:$0xff] %vm816_vm3, %v755_v38  ;;  %833 = vst.msk [vmem:[#allocation2 + $0x80] sm:$0xff] %vm816_vm3, %v753_v55 }
 0x127   : > { %1146 = vrot.lane.b32.xlu1 %v3030_v2, %s2658_s23  ;;  %1114 = vrot.lane.b32.xlu0 %v2980_v14, %s2658_s23 }
 0x129   : > { %v759_v21 = vpop.permute.xlu1 %758  ;;  %v757_v40 = vpop.permute.xlu0 %756 }
 0x12a   : > { %836 = vst.msk [vmem:[#allocation2 + $0x98] sm:$0xff] %vm816_vm3, %v759_v21  ;;  %835 = vst.msk [vmem:[#allocation2 + $0x90] sm:$0xff] %vm816_vm3, %v757_v40 }
 0x12b   : > { %1724 = vrot.lane.b32.xlu1 %v3027_v0, %s2661_s6  ;;  %1692 = vrot.lane.b32.xlu0 %v2977_v12, %s2661_s6 }
 0x12d   : > { %v763_v51 = vpop.permute.xlu1 %762  ;;  %v761_v56 = vpop.permute.xlu0 %760 }
 0x12e   : > { %838 = vst.msk [vmem:[#allocation2 + $0xa8] sm:$0xff] %vm816_vm3, %v763_v51  ;;  %837 = vst.msk [vmem:[#allocation2 + $0xa0] sm:$0xff] %vm816_vm3, %v761_v56  ;;  %v2360_v51 = vld [vmem:[%s2699_s18 + $0x90] sm:$0xff] }
 0x12f   : > { %1148 = vrot.lane.b32.xlu1 %v3027_v0, %s2658_s23  ;;  %1116 = vrot.lane.b32.xlu0 %v2977_v12, %s2658_s23  ;;  %v2404_v12 = vld [vmem:[%s2699_s18 + $0x121] sm:$0xff] }
 0x130   : > { %v2388_v0 = vld [vmem:[%s2699_s18 + $0x61] sm:$0xff] }
 0x131   : > { %v767_v14 = vpop.permute.xlu1 %766  ;;  %v765_v2 = vpop.permute.xlu0 %764 }
 0x132   : > { %840 = vst.msk [vmem:[#allocation2 + $0xb8] sm:$0xff] %vm816_vm3, %v767_v14  ;;  %839 = vst.msk [vmem:[#allocation2 + $0xb0] sm:$0xff] %vm816_vm3, %v765_v2  ;;  %v2361_v2 = vld [vmem:[%s2699_s18 + $0x98] sm:$0xff] }
 0x133   : > { %1340 = vrot.lane.b32.xlu1 %v2876_v46, %s2659_s5  ;;  %1308 = vrot.lane.b32.xlu0 %v2782_v26, %s2659_s5 }
 0x135   : > { %v771_v13 = vpop.permute.xlu1 %770  ;;  %v769_v17 = vpop.permute.xlu0 %768 }
 0x136   : > { %842 = vst.msk [vmem:[#allocation2 + $0xc8] sm:$0xff] %vm816_vm3, %v771_v13  ;;  %841 = vst.msk [vmem:[#allocation2 + $0xc0] sm:$0xff] %vm816_vm3, %v769_v17 }
 0x137   : > { %1342 = vrot.lane.b32.xlu1 %v2873_v45, %s2659_s5  ;;  %1310 = vrot.lane.b32.xlu0 %v2779_v25, %s2659_s5  ;;  %v2405_v25 = vld [vmem:[%s2699_s18 + $0x129] sm:$0xff] }
 0x139   : > { %v775_v46 = vpop.permute.xlu1 %774  ;;  %v773_v20 = vpop.permute.xlu0 %772 }
 0x13a   : > { %844 = vst.msk [vmem:[#allocation2 + $0xd8] sm:$0xff] %vm816_vm3, %v775_v46  ;;  %843 = vst.msk [vmem:[#allocation2 + $0xd0] sm:$0xff] %vm816_vm3, %v773_v20 }
 0x13b   : > { %1533 = vrot.lane.b32.xlu1 %v2404_v12, %s2660_s16  ;;  %1501 = vrot.lane.b32.xlu0 %v2388_v0, %s2660_s16 }
 0x13d   : > { %v779_v26 = vpop.permute.xlu1 %778  ;;  %v777_v45 = vpop.permute.xlu0 %776 }
 0x13e   : > { %846 = vst.msk [vmem:[#allocation2 + $0xe8] sm:$0xff] %vm816_vm3, %v779_v26  ;;  %845 = vst.msk [vmem:[#allocation2 + $0xe0] sm:$0xff] %vm816_vm3, %v777_v45  ;;  %v2409_v26 = vld [vmem:[%s2699_s18 + $0x159] sm:$0xff] }
 0x13f   : > { %957 = vrot.lane.b32.xlu1 %v2404_v12, %s2657_s22  ;;  %925 = vrot.lane.b32.xlu0 %v2388_v0, %s2657_s22  ;;  %v2408_v12 = vld [vmem:[%s2699_s18 + $0x151] sm:$0xff]  ;;  %v2393_v45 = vld [vmem:[%s2699_s18 + $0x99] sm:$0xff] }
 0x140   : > { %v2392_v0 = vld [vmem:[%s2699_s18 + $0x91] sm:$0xff] }
 0x141   : > { %v783_v59 = vpop.permute.xlu1 %782  ;;  %v781_v4 = vpop.permute.xlu0 %780 }
 0x142   : > { %848 = vst.msk [vmem:[#allocation2 + $0xf8] sm:$0xff] %vm816_vm3, %v783_v59  ;;  %847 = vst.msk [vmem:[#allocation2 + $0xf0] sm:$0xff] %vm816_vm3, %v781_v4  ;;  %v2440_v59 = vld [vmem:[%s2699_s18 + $0x152] sm:$0xff] }
 0x143   : > { %1535 = vrot.lane.b32.xlu1 %v2405_v25, %s2660_s16  ;;  %1503 = vrot.lane.b32.xlu0 %v2389_v39, %s2660_s16  ;;  %v2424_v4 = vld [vmem:[%s2699_s18 + $0x92] sm:$0xff] }
 0x145   : > { %v916_v22 = vpop.permute.xlu1 %915  ;;  %v914_v16 = vpop.permute.xlu0 %913 }
 0x146   : > { %1011 = vst.msk [vmem:[#allocation2 + $0x8] sm:$0xff] %vm1009_vm4, %v916_v22  ;;  %1010 = vst.msk [vmem:[#allocation2] sm:$0xff] %vm1009_vm4, %v914_v16 }
 0x147   : > { %1726 = vrot.lane.b32.xlu1 %v3038_v15, %s2661_s6  ;;  %1694 = vrot.lane.b32.xlu0 %v2420_v19, %s2661_s6  ;;  %v2437_v15 = vld [vmem:[%s2699_s18 + $0x12a] sm:$0xff] }
 0x149   : > { %v948_v18 = vpop.permute.xlu1 %947  ;;  %v946_v30 = vpop.permute.xlu0 %945 }
 0x14a   : > { %1027 = vst.msk [vmem:[#allocation2 + $0x88] sm:$0xff] %vm1009_vm4, %v948_v18  ;;  %1026 = vst.msk [vmem:[#allocation2 + $0x80] sm:$0xff] %vm1009_vm4, %v946_v30 }
 0x14b   : > { %959 = vrot.lane.b32.xlu1 %v2405_v25, %s2657_s22  ;;  %927 = vrot.lane.b32.xlu0 %v2389_v39, %s2657_s22 }
 0x14d   : > { %v1139_v6 = vpop.permute.xlu1 %1138  ;;  %v1107_v48 = vpop.permute.xlu0 %1106 }
 0x14e   : > { %1219 = vst.msk [vmem:[#allocation2 + $0x80] sm:$0xff] %vm1202_vm5, %v1139_v6  ;;  %1203 = vst.msk [vmem:[#allocation2] sm:$0xff] %vm1202_vm5, %v1107_v48 }
 0x14f   : > { %1150 = vrot.lane.b32.xlu1 %v2342_v31, %s2658_s23  ;;  %1118 = vrot.lane.b32.xlu0 %v2420_v19, %s2658_s23 }
 0x151   : > { %v1141_v58 = vpop.permute.xlu1 %1140  ;;  %v1109_v29 = vpop.permute.xlu0 %1108 }
 0x152   : > { %1220 = vst.msk [vmem:[#allocation2 + $0x88] sm:$0xff] %vm1202_vm5, %v1141_v58  ;;  %1204 = vst.msk [vmem:[#allocation2 + $0x8] sm:$0xff] %vm1202_vm5, %v1109_v29 }
 0x153   : > { %1728 = vrot.lane.b32.xlu1 %v2437_v15, %s2661_s6  ;;  %1696 = vrot.lane.b32.xlu0 %v2421_v57, %s2661_s6 }
 0x155   : > { %v1333_v32 = vpop.permute.xlu1 %1332  ;;  %v1301_v1 = vpop.permute.xlu0 %1300 }
 0x156   : > { %1413 = vst.msk [vmem:[#allocation2 + $0x80] sm:$0xff] %vm1396_vm6, %v1333_v32  ;;  %1397 = vst.msk [vmem:[#allocation2] sm:$0xff] %vm1396_vm6, %v1301_v1 }
 0x157   : > { %1152 = vrot.lane.b32.xlu1 %v2437_v15, %s2658_s23  ;;  %1120 = vrot.lane.b32.xlu0 %v2421_v57, %s2658_s23  ;;  %v2441_v15 = vld [vmem:[%s2699_s18 + $0x15a] sm:$0xff] }
 0x158   : > { %v2425_v57 = vld [vmem:[%s2699_s18 + $0x9a] sm:$0xff] }
 0x159   : > { %v1335_v3 = vpop.permute.xlu1 %1334  ;;  %v1303_v43 = vpop.permute.xlu0 %1302 }
 0x15a   : > { %1414 = vst.msk [vmem:[#allocation2 + $0x88] sm:$0xff] %vm1396_vm6, %v1335_v3  ;;  %1398 = vst.msk [vmem:[#allocation2 + $0x8] sm:$0xff] %vm1396_vm6, %v1303_v43 }
 0x15b   : > { %1344 = vrot.lane.b32.xlu1 %v2896_v50, %s2659_s5  ;;  %1312 = vrot.lane.b32.xlu0 %v2794_v28, %s2659_s5  ;;  %v2390_v50 = vld [vmem:[%s2699_s18 + $0x79] sm:$0xff] }
 0x15d   : > { %v1526_v44 = vpop.permute.xlu1 %1525  ;;  %v1494_v33 = vpop.permute.xlu0 %1493 }
 0x15e   : > { %1606 = vst.msk [vmem:[#allocation2 + $0x80] sm:$0xff] %vm1589_vm7, %v1526_v44  ;;  %1590 = vst.msk [vmem:[#allocation2] sm:$0xff] %vm1589_vm7, %v1494_v33  ;;  %v2378_v44 = vld [vmem:[%s2699_s18 + $0x168] sm:$0xff] }
 0x15f   : > { %1346 = vrot.lane.b32.xlu1 %v2893_v49, %s2659_s5  ;;  %1314 = vrot.lane.b32.xlu0 %v2791_v27, %s2659_s5  ;;  %v2407_v27 = vld [vmem:[%s2699_s18 + $0x141] sm:$0xff] }
 0x160   : > { %v2362_v33 = vld [vmem:[%s2699_s18 + $0xa8] sm:$0xff] }
 0x161   : > { %v950_v61 = vpop.permute.xlu1 %949  ;;  %v918_v34 = vpop.permute.xlu0 %917 }
 0x162   : > { %1028 = vst.msk [vmem:[#allocation2 + $0x90] sm:$0xff] %vm1009_vm4, %v950_v61  ;;  %1012 = vst.msk [vmem:[#allocation2 + $0x10] sm:$0xff] %vm1009_vm4, %v918_v34  ;;  %v2379_v61 = vld [vmem:[%s2699_s18 + $0x170] sm:$0xff] }
 0x163   : > { %1537 = vrot.lane.b32.xlu1 %v2406_v9, %s2660_s16  ;;  %1505 = vrot.lane.b32.xlu0 %v2390_v50, %s2660_s16  ;;  %v2363_v34 = vld [vmem:[%s2699_s18 + $0xb0] sm:$0xff] }
 0x165   : > { %v1528_v28 = vpop.permute.xlu1 %1527  ;;  %v1496_v49 = vpop.permute.xlu0 %1495 }
 0x166   : > { %1607 = vst.msk [vmem:[#allocation2 + $0x88] sm:$0xff] %vm1589_vm7, %v1528_v28  ;;  %1591 = vst.msk [vmem:[#allocation2 + $0x8] sm:$0xff] %vm1589_vm7, %v1496_v49 }
 0x167   : > { %961 = vrot.lane.b32.xlu1 %v2406_v9, %s2657_s22  ;;  %929 = vrot.lane.b32.xlu0 %v2390_v50, %s2657_s22 }
 0x169   : > { %v1719_v47 = vpop.permute.xlu1 %1718  ;;  %v1687_v11 = vpop.permute.xlu0 %1686 }
 0x16a   : > { %1799 = vst.msk [vmem:[#allocation2 + $0x80] sm:$0xff] %vm1782_vm8, %v1719_v47  ;;  %1783 = vst.msk [vmem:[#allocation2] sm:$0xff] %vm1782_vm8, %v1687_v11 }
 0x16b   : > { %1539 = vrot.lane.b32.xlu1 %v2407_v27, %s2660_s16  ;;  %1507 = vrot.lane.b32.xlu0 %v2391_v5, %s2660_s16 }
 0x16d   : > { %v952_v36 = vpop.permute.xlu1 %951  ;;  %v920_v10 = vpop.permute.xlu0 %919 }
 0x16e   : > { %1029 = vst.msk [vmem:[#allocation2 + $0x98] sm:$0xff] %vm1009_vm4, %v952_v36  ;;  %1013 = vst.msk [vmem:[#allocation2 + $0x18] sm:$0xff] %vm1009_vm4, %v920_v10  ;;  %v2411_v36 = vld [vmem:[%s2699_s18 + $0x171] sm:$0xff] }
 0x16f   : > { %1730 = vrot.lane.b32.xlu1 %v2438_v63, %s2661_s6  ;;  %1698 = vrot.lane.b32.xlu0 %v2422_v35, %s2661_s6  ;;  %v2395_v10 = vld [vmem:[%s2699_s18 + $0xb1] sm:$0xff] }
 0x171   : > { %v1143_v62 = vpop.permute.xlu1 %1142  ;;  %v1111_v24 = vpop.permute.xlu0 %1110  ;;  %v1815_v42 = vld [vmem:[#allocation2] sm:$0xff] }
 0x172   : > { %v1831_v23 = vld [vmem:[#allocation2 + $0x80] sm:$0xff]  ;;  %1221 = vst.msk [vmem:[#allocation2 + $0x90] sm:$0xff] %vm1202_vm5, %v1143_v62  ;;  %1205 = vst.msk [vmem:[#allocation2 + $0x10] sm:$0xff] %vm1202_vm5, %v1111_v24  ;;  %2531 = vmatprep.mubr.f32.mxu0 %v1815_v42  ;;  %v2442_v42 = vld [vmem:[%s2699_s18 + $0x16a] sm:$0xff] }
 0x173   : > { %2555 = vmatprep.mubr.f32.mxu1 %v1831_v23  ;;  %963 = vrot.lane.b32.xlu1 %v2407_v27, %s2657_s22  ;;  %v2410_v27 = vld [vmem:[%s2699_s18 + $0x169] sm:$0xff] }
 0x174   : > { %931 = vrot.lane.b32.xlu0 %v2391_v5, %s2657_s22  ;;  %v2394_v5 = vld [vmem:[%s2699_s18 + $0xa9] sm:$0xff] }
 0x175   : > { %v1721_v41 = vpop.permute.xlu1 %1720  ;;  %v1689_v7 = vpop.permute.xlu0 %1688  ;;  %v2426_v23 = vld [vmem:[%s2699_s18 + $0xaa] sm:$0xff] }
 0x176   : > { %1800 = vst.msk [vmem:[#allocation2 + $0x88] sm:$0xff] %vm1782_vm8, %v1721_v41  ;;  %1784 = vst.msk [vmem:[#allocation2 + $0x8] sm:$0xff] %vm1782_vm8, %v1689_v7 }
 0x177   : > { %1154 = vrot.lane.b32.xlu1 %v2438_v63, %s2658_s23 }
 0x178   : > { %1122 = vrot.lane.b32.xlu0 %v2422_v35, %s2658_s23 }
 0x179   : > { %v1145_v8 = vpop.permute.xlu1 %1144  ;;  %v1113_v52 = vpop.permute.xlu0 %1112 }
 0x17a   : > { %1222 = vst.msk [vmem:[#allocation2 + $0x98] sm:$0xff] %vm1202_vm5, %v1145_v8  ;;  %1206 = vst.msk [vmem:[#allocation2 + $0x18] sm:$0xff] %vm1202_vm5, %v1113_v52 }
 0x17b   : > { %1732 = vrot.lane.b32.xlu1 %v2439_v60, %s2661_s6 }
 0x17c   : > { %1700 = vrot.lane.b32.xlu0 %v2423_v37, %s2661_s6 }
 0x17d   : > { %v1337_v38 = vpop.permute.xlu1 %1336  ;;  %v1305_v55 = vpop.permute.xlu0 %1304  ;;  %v1816_v21 = vld [vmem:[#allocation2 + $0x8] sm:$0xff] }
 0x17e   : > { %v1832_v40 = vld [vmem:[#allocation2 + $0x88] sm:$0xff]  ;;  %1415 = vst.msk [vmem:[#allocation2 + $0x90] sm:$0xff] %vm1396_vm6, %v1337_v38  ;;  %1399 = vst.msk [vmem:[#allocation2 + $0x10] sm:$0xff] %vm1396_vm6, %v1305_v55  ;;  %2532 = vmatmul.mubr.f32.vlgmr.msra.gmra.mrb[0].mxu0 %v1816_v21  ;;  %v2443_v21 = vld [vmem:[%s2699_s18 + $0x172] sm:$0xff] }
 0x17f   : > { %2556 = vmatmul.mubr.f32.vlgmr.msra.gmra.mrb[0].mxu1 %v1832_v40  ;;  %1156 = vrot.lane.b32.xlu1 %v2439_v60, %s2658_s23  ;;  %v2427_v40 = vld [vmem:[%s2699_s18 + $0xb2] sm:$0xff] }
 0x180   : > { %1124 = vrot.lane.b32.xlu0 %v2423_v37, %s2658_s23 }
 0x181   : > { %v1339_v56 = vpop.permute.xlu1 %1338  ;;  %v1307_v14 = vpop.permute.xlu0 %1306 }
 0x182   : > { %1416 = vst.msk [vmem:[#allocation2 + $0x98] sm:$0xff] %vm1396_vm6, %v1339_v56  ;;  %1400 = vst.msk [vmem:[#allocation2 + $0x18] sm:$0xff] %vm1396_vm6, %v1307_v14 }
 0x183   : > { %1348 = vrot.lane.b32.xlu1 %v2916_v54, %s2659_s5 }
 0x184   : > { %1316 = vrot.lane.b32.xlu0 %v2360_v51, %s2659_s5 }
 0x185   : > { %v1530_v13 = vpop.permute.xlu1 %1529  ;;  %v1498_v17 = vpop.permute.xlu0 %1497 }
 0x186   : > { %1608 = vst.msk [vmem:[#allocation2 + $0x90] sm:$0xff] %vm1589_vm7, %v1530_v13  ;;  %1592 = vst.msk [vmem:[#allocation2 + $0x10] sm:$0xff] %vm1589_vm7, %v1498_v17 }
 0x187   : > { %1350 = vrot.lane.b32.xlu1 %v2913_v53, %s2659_s5 }
 0x188   : > { %1318 = vrot.lane.b32.xlu0 %v2361_v2, %s2659_s5 }
 0x189   : > { %v954_v46 = vpop.permute.xlu1 %953  ;;  %v922_v54 = vpop.permute.xlu0 %921 }
 0x18a   : > { %1030 = vst.msk [vmem:[#allocation2 + $0xa0] sm:$0xff] %vm1009_vm4, %v954_v46  ;;  %1014 = vst.msk [vmem:[#allocation2 + $0x20] sm:$0xff] %vm1009_vm4, %v922_v54 }
 0x18b   : > { %1541 = vrot.lane.b32.xlu1 %v2408_v12, %s2660_s16 }
 0x18c   : > { %1509 = vrot.lane.b32.xlu0 %v2392_v0, %s2660_s16 }
 0x18d   : > { %v1532_v20 = vpop.permute.xlu1 %1531  ;;  %v1500_v53 = vpop.permute.xlu0 %1499 }
 0x18e   : > { %1609 = vst.msk [vmem:[#allocation2 + $0x98] sm:$0xff] %vm1589_vm7, %v1532_v20  ;;  %1593 = vst.msk [vmem:[#allocation2 + $0x18] sm:$0xff] %vm1589_vm7, %v1500_v53  ;;  %v2381_v20 = vld [vmem:[%s2699_s18 + $0x188] sm:$0xff] }
 0x18f   : > { %965 = vrot.lane.b32.xlu1 %v2408_v12, %s2657_s22  ;;  %v2380_v12 = vld [vmem:[%s2699_s18 + $0x180] sm:$0xff]  ;;  %v2365_v53 = vld [vmem:[%s2699_s18 + $0xc8] sm:$0xff] }
 0x190   : > { %933 = vrot.lane.b32.xlu0 %v2392_v0, %s2657_s22  ;;  %v2364_v0 = vld [vmem:[%s2699_s18 + $0xc0] sm:$0xff] }
 0x191   : > { %v1723_v25 = vpop.permute.xlu1 %1722  ;;  %v1691_v39 = vpop.permute.xlu0 %1690 }
 0x192   : > { %1801 = vst.msk [vmem:[#allocation2 + $0x90] sm:$0xff] %vm1782_vm8, %v1723_v25  ;;  %1785 = vst.msk [vmem:[#allocation2 + $0x10] sm:$0xff] %vm1782_vm8, %v1691_v39  ;;  %v2412_v25 = vld [vmem:[%s2699_s18 + $0x181] sm:$0xff] }
 0x193   : > { %1543 = vrot.lane.b32.xlu1 %v2409_v26, %s2660_s16  ;;  %v2396_v39 = vld [vmem:[%s2699_s18 + $0xc1] sm:$0xff] }
 0x194   : > { %1511 = vrot.lane.b32.xlu0 %v2393_v45, %s2660_s16 }
 0x195   : > { %v956_v19 = vpop.permute.xlu1 %955  ;;  %v924_v22 = vpop.permute.xlu0 %923 }
 0x196   : > { %1031 = vst.msk [vmem:[#allocation2 + $0xa8] sm:$0xff] %vm1009_vm4, %v956_v19  ;;  %1015 = vst.msk [vmem:[#allocation2 + $0x28] sm:$0xff] %vm1009_vm4, %v924_v22 }
 0x197   : > { %1734 = vrot.lane.b32.xlu1 %v2440_v59, %s2661_s6 }
 0x198   : > { %1702 = vrot.lane.b32.xlu0 %v2424_v4, %s2661_s6 }
 0x199   : > { %v1147_v16 = vpop.permute.xlu1 %1146  ;;  %v1115_v18 = vpop.permute.xlu0 %1114  ;;  %v1817_v30 = vld [vmem:[#allocation2 + $0x10] sm:$0xff] }
 0x19a   : > { %v1833_v31 = vld [vmem:[#allocation2 + $0x90] sm:$0xff]  ;;  %1223 = vst.msk [vmem:[#allocation2 + $0xa0] sm:$0xff] %vm1202_vm5, %v1147_v16  ;;  %1207 = vst.msk [vmem:[#allocation2 + $0x20] sm:$0xff] %vm1202_vm5, %v1115_v18  ;;  %2534 = vmatprep.mubr.f32.mxu0 %v1817_v30 }
 0x19b   : > { %2558 = vmatprep.mubr.f32.mxu1 %v1833_v31  ;;  %967 = vrot.lane.b32.xlu1 %v2409_v26, %s2657_s22  ;;  %v2413_v16 = vld [vmem:[%s2699_s18 + $0x189] sm:$0xff] }
 0x19c   : > { %935 = vrot.lane.b32.xlu0 %v2393_v45, %s2657_s22  ;;  %v2397_v18 = vld [vmem:[%s2699_s18 + $0xc9] sm:$0xff] }
 0x19d   : > { %v1725_v6 = vpop.permute.xlu1 %1724  ;;  %v1693_v48 = vpop.permute.xlu0 %1692 }
 0x19e   : > { %1802 = vst.msk [vmem:[#allocation2 + $0x98] sm:$0xff] %vm1782_vm8, %v1725_v6  ;;  %1786 = vst.msk [vmem:[#allocation2 + $0x18] sm:$0xff] %vm1782_vm8, %v1693_v48  ;;  %v2444_v6 = vld [vmem:[%s2699_s18 + $0x182] sm:$0xff] }
 0x19f   : > { %1158 = vrot.lane.b32.xlu1 %v2440_v59, %s2658_s23  ;;  %v2428_v48 = vld [vmem:[%s2699_s18 + $0xc2] sm:$0xff] }
 0x1a0   : > { %1126 = vrot.lane.b32.xlu0 %v2424_v4, %s2658_s23 }
 0x1a1   : > { %v1149_v58 = vpop.permute.xlu1 %1148  ;;  %v1117_v29 = vpop.permute.xlu0 %1116 }
 0x1a2   : > { %1224 = vst.msk [vmem:[#allocation2 + $0xa8] sm:$0xff] %vm1202_vm5, %v1149_v58  ;;  %1208 = vst.msk [vmem:[#allocation2 + $0x28] sm:$0xff] %vm1202_vm5, %v1117_v29 }
 0x1a3   : > { %1736 = vrot.lane.b32.xlu1 %v2441_v15, %s2661_s6 }
 0x1a4   : > { %1704 = vrot.lane.b32.xlu0 %v2425_v57, %s2661_s6 }
 0x1a5   : > { %v1341_v32 = vpop.permute.xlu1 %1340  ;;  %v1309_v1 = vpop.permute.xlu0 %1308  ;;  %v1818_v3 = vld [vmem:[#allocation2 + $0x18] sm:$0xff] }
 0x1a6   : > { %v1834_v43 = vld [vmem:[#allocation2 + $0x98] sm:$0xff]  ;;  %1417 = vst.msk [vmem:[#allocation2 + $0xa0] sm:$0xff] %vm1396_vm6, %v1341_v32  ;;  %1401 = vst.msk [vmem:[#allocation2 + $0x20] sm:$0xff] %vm1396_vm6, %v1309_v1  ;;  %2535 = vmatmul.mubr.f32.gmra.mrb[2].mxu0 %v1818_v3 }
 0x1a7   : > { %2559 = vmatmul.mubr.f32.gmra.mrb[2].mxu1 %v1834_v43  ;;  %1160 = vrot.lane.b32.xlu1 %v2441_v15, %s2658_s23 }
 0x1a8   : > { %1128 = vrot.lane.b32.xlu0 %v2425_v57, %s2658_s23 }
 0x1a9   : > { %v1343_v9 = vpop.permute.xlu1 %1342  ;;  %v1311_v50 = vpop.permute.xlu0 %1310 }
 0x1aa   : > { %1418 = vst.msk [vmem:[#allocation2 + $0xa8] sm:$0xff] %vm1396_vm6, %v1343_v9  ;;  %1402 = vst.msk [vmem:[#allocation2 + $0x28] sm:$0xff] %vm1396_vm6, %v1311_v50 }
 0x1ab   : > { %1352 = vrot.lane.b32.xlu1 %v2378_v44, %s2659_s5  ;;  %v2445_v44 = vld [vmem:[%s2699_s18 + $0x18a] sm:$0xff] }
 0x1ac   : > { %1320 = vrot.lane.b32.xlu0 %v2362_v33, %s2659_s5  ;;  %v2429_v33 = vld [vmem:[%s2699_s18 + $0xca] sm:$0xff] }
 0x1ad   : > { %v1534_v28 = vpop.permute.xlu1 %1533  ;;  %v1502_v49 = vpop.permute.xlu0 %1501 }
 0x1ae   : > { %1610 = vst.msk [vmem:[#allocation2 + $0xa0] sm:$0xff] %vm1589_vm7, %v1534_v28  ;;  %1594 = vst.msk [vmem:[#allocation2 + $0x20] sm:$0xff] %vm1589_vm7, %v1502_v49 }
 0x1af   : > { %1354 = vrot.lane.b32.xlu1 %v2379_v61, %s2659_s5 }
 0x1b0   : > { %1322 = vrot.lane.b32.xlu0 %v2363_v34, %s2659_s5 }
 0x1b1   : > { %v958_v47 = vpop.permute.xlu1 %957  ;;  %v926_v11 = vpop.permute.xlu0 %925 }
 0x1b2   : > { %1032 = vst.msk [vmem:[#allocation2 + $0xb0] sm:$0xff] %vm1009_vm4, %v958_v47  ;;  %1016 = vst.msk [vmem:[#allocation2 + $0x30] sm:$0xff] %vm1009_vm4, %v926_v11 }
 0x1b3   : > { %1545 = vrot.lane.b32.xlu1 %v2410_v27, %s2660_s16 }
 0x1b4   : > { %1513 = vrot.lane.b32.xlu0 %v2394_v5, %s2660_s16 }
 0x1b5   : > { %v1536_v63 = vpop.permute.xlu1 %1535  ;;  %v1504_v35 = vpop.permute.xlu0 %1503 }
 0x1b6   : > { %1611 = vst.msk [vmem:[#allocation2 + $0xa8] sm:$0xff] %vm1589_vm7, %v1536_v63  ;;  %1595 = vst.msk [vmem:[#allocation2 + $0x28] sm:$0xff] %vm1589_vm7, %v1504_v35  ;;  %v2383_v63 = vld [vmem:[%s2699_s18 + $0x1a0] sm:$0xff] }
 0x1b7   : > { %969 = vrot.lane.b32.xlu1 %v2410_v27, %s2657_s22  ;;  %v2382_v27 = vld [vmem:[%s2699_s18 + $0x198] sm:$0xff]  ;;  %v2367_v35 = vld [vmem:[%s2699_s18 + $0xe0] sm:$0xff] }
 0x1b8   : > { %937 = vrot.lane.b32.xlu0 %v2394_v5, %s2657_s22  ;;  %v2366_v5 = vld [vmem:[%s2699_s18 + $0xd8] sm:$0xff] }
 0x1b9   : > { %v1727_v62 = vpop.permute.xlu1 %1726  ;;  %v1695_v24 = vpop.permute.xlu0 %1694 }
 0x1ba   : > { %1803 = vst.msk [vmem:[#allocation2 + $0xa0] sm:$0xff] %vm1782_vm8, %v1727_v62  ;;  %1787 = vst.msk [vmem:[#allocation2 + $0x20] sm:$0xff] %vm1782_vm8, %v1695_v24  ;;  %v2414_v62 = vld [vmem:[%s2699_s18 + $0x199] sm:$0xff] }
 0x1bb   : > { %1547 = vrot.lane.b32.xlu1 %v2411_v36, %s2660_s16  ;;  %v2398_v24 = vld [vmem:[%s2699_s18 + $0xd9] sm:$0xff] }
 0x1bc   : > { %1515 = vrot.lane.b32.xlu0 %v2395_v10, %s2660_s16 }
 0x1bd   : > { %v960_v41 = vpop.permute.xlu1 %959  ;;  %v928_v7 = vpop.permute.xlu0 %927 }
 0x1be   : > { %1033 = vst.msk [vmem:[#allocation2 + $0xb8] sm:$0xff] %vm1009_vm4, %v960_v41  ;;  %1017 = vst.msk [vmem:[#allocation2 + $0x38] sm:$0xff] %vm1009_vm4, %v928_v7  ;;  %v2415_v41 = vld [vmem:[%s2699_s18 + $0x1a1] sm:$0xff] }
 0x1bf   : > { %1738 = vrot.lane.b32.xlu1 %v2442_v42, %s2661_s6  ;;  %v2399_v7 = vld [vmem:[%s2699_s18 + $0xe1] sm:$0xff] }
 0x1c0   : > { %1706 = vrot.lane.b32.xlu0 %v2426_v23, %s2661_s6 }
 0x1c1   : > { %v1151_v60 = vpop.permute.xlu1 %1150  ;;  %v1119_v37 = vpop.permute.xlu0 %1118  ;;  %v1819_v8 = vld [vmem:[#allocation2 + $0x20] sm:$0xff] }
 0x1c2   : > { %v1835_v52 = vld [vmem:[#allocation2 + $0xa0] sm:$0xff]  ;;  %1225 = vst.msk [vmem:[#allocation2 + $0xb0] sm:$0xff] %vm1202_vm5, %v1151_v60  ;;  %1209 = vst.msk [vmem:[#allocation2 + $0x30] sm:$0xff] %vm1202_vm5, %v1119_v37  ;;  %2537 = vmatprep.mubr.f32.mxu0 %v1819_v8 }
 0x1c3   : > { %2561 = vmatprep.mubr.f32.mxu1 %v1835_v52  ;;  %971 = vrot.lane.b32.xlu1 %v2411_v36, %s2657_s22  ;;  %v2446_v8 = vld [vmem:[%s2699_s18 + $0x19a] sm:$0xff] }
 0x1c4   : > { %939 = vrot.lane.b32.xlu0 %v2395_v10, %s2657_s22  ;;  %v2430_v52 = vld [vmem:[%s2699_s18 + $0xda] sm:$0xff] }
 0x1c5   : > { %v1729_v38 = vpop.permute.xlu1 %1728  ;;  %v1697_v55 = vpop.permute.xlu0 %1696 }
 0x1c6   : > { %1804 = vst.msk [vmem:[#allocation2 + $0xa8] sm:$0xff] %vm1782_vm8, %v1729_v38  ;;  %1788 = vst.msk [vmem:[#allocation2 + $0x28] sm:$0xff] %vm1782_vm8, %v1697_v55 }
 0x1c7   : > { %1162 = vrot.lane.b32.xlu1 %v2442_v42, %s2658_s23 }
 0x1c8   : > { %1130 = vrot.lane.b32.xlu0 %v2426_v23, %s2658_s23 }
 0x1c9   : > { %v1153_v51 = vpop.permute.xlu1 %1152  ;;  %v1121_v56 = vpop.permute.xlu0 %1120 }
 0x1ca   : > { %1226 = vst.msk [vmem:[#allocation2 + $0xb8] sm:$0xff] %vm1202_vm5, %v1153_v51  ;;  %1210 = vst.msk [vmem:[#allocation2 + $0x38] sm:$0xff] %vm1202_vm5, %v1121_v56 }
 0x1cb   : > { %1740 = vrot.lane.b32.xlu1 %v2443_v21, %s2661_s6 }
 0x1cc   : > { %1708 = vrot.lane.b32.xlu0 %v2427_v40, %s2661_s6 }
 0x1cd   : > { %v1345_v14 = vpop.permute.xlu1 %1344  ;;  %v1313_v2 = vpop.permute.xlu0 %1312  ;;  %v1820_v13 = vld [vmem:[#allocation2 + $0x28] sm:$0xff] }
 0x1ce   : > { %v1836_v17 = vld [vmem:[#allocation2 + $0xa8] sm:$0xff]  ;;  %1419 = vst.msk [vmem:[#allocation2 + $0xb0] sm:$0xff] %vm1396_vm6, %v1345_v14  ;;  %1403 = vst.msk [vmem:[#allocation2 + $0x30] sm:$0xff] %vm1396_vm6, %v1313_v2  ;;  %2538 = vmatmul.mubr.f32.gmra.mrb[4].mxu0 %v1820_v13 }
 0x1cf   : > { %2562 = vmatmul.mubr.f32.gmra.mrb[4].mxu1 %v1836_v17  ;;  %1164 = vrot.lane.b32.xlu1 %v2443_v21, %s2658_s23  ;;  %v2447_v21 = vld [vmem:[%s2699_s18 + $0x1a2] sm:$0xff] }
 0x1d0   : > { %1132 = vrot.lane.b32.xlu0 %v2427_v40, %s2658_s23  ;;  %v2431_v40 = vld [vmem:[%s2699_s18 + $0xe2] sm:$0xff]  ;;  %s2254_s18 = sshll.u32 %s2688_s13, 5 }
 0x1d1   : > { %v1347_v46 = vpop.permute.xlu1 %1346  ;;  %v1315_v54 = vpop.permute.xlu0 %1314  ;;  %p167_p4 = scmp.lt.s32.totalorder %s2254_s18, 63 }
 0x1d2   : > { %1420 = vst.msk [vmem:[#allocation2 + $0xb8] sm:$0xff] %vm1396_vm6, %v1347_v46  ;;  %1404 = vst.msk [vmem:[#allocation2 + $0x38] sm:$0xff] %vm1396_vm6, %v1315_v54 }
 0x1d3   : > { %1356 = vrot.lane.b32.xlu1 %v2380_v12, %s2659_s5  ;;  %s3818_s18 = smov (!%p167_p4, %s2254_s18), 63 }
 0x1d4   : > { %1324 = vrot.lane.b32.xlu0 %v2364_v0, %s2659_s5  ;;  %s2255_s13 = sshll.u32 %s3818_s18, 3 }
 0x1d5   : > { %v1538_v26 = vpop.permute.xlu1 %1537  ;;  %v1506_v45 = vpop.permute.xlu0 %1505  ;;  %s3690_s14 = scalar_lea.vmem %s3816_s3, %s2255_s13 }
 0x1d6   : > { %1612 = vst.msk [vmem:[#allocation2 + $0xb0] sm:$0xff] %vm1589_vm7, %v1538_v26  ;;  %1596 = vst.msk [vmem:[#allocation2 + $0x30] sm:$0xff] %vm1589_vm7, %v1506_v45 }
 0x1d7   : > { %1358 = vrot.lane.b32.xlu1 %v2381_v20, %s2659_s5 }
 0x1d8   : > { %1326 = vrot.lane.b32.xlu0 %v2365_v53, %s2659_s5 }
 0x1d9   : > { %v962_v59 = vpop.permute.xlu1 %961  ;;  %v930_v4 = vpop.permute.xlu0 %929 }
 0x1da   : > { %1034 = vst.msk [vmem:[#allocation2 + $0xc0] sm:$0xff] %vm1009_vm4, %v962_v59  ;;  %1018 = vst.msk [vmem:[#allocation2 + $0x40] sm:$0xff] %vm1009_vm4, %v930_v4 }
 0x1db   : > { %1549 = vrot.lane.b32.xlu1 %v2412_v25, %s2660_s16 }
 0x1dc   : > { %1517 = vrot.lane.b32.xlu0 %v2396_v39, %s2660_s16 }
 0x1dd   : > { %v1540_v19 = vpop.permute.xlu1 %1539  ;;  %v1508_v22 = vpop.permute.xlu0 %1507 }
 0x1de   : > { %1613 = vst.msk [vmem:[#allocation2 + $0xb8] sm:$0xff] %vm1589_vm7, %v1540_v19  ;;  %1597 = vst.msk [vmem:[#allocation2 + $0x38] sm:$0xff] %vm1589_vm7, %v1508_v22 }
 0x1df   : > { %973 = vrot.lane.b32.xlu1 %v2412_v25, %s2657_s22 }
 0x1e0   : > { %941 = vrot.lane.b32.xlu0 %v2396_v39, %s2657_s22 }
 0x1e1   : > { %v1731_v30 = vpop.permute.xlu1 %1730  ;;  %v1699_v31 = vpop.permute.xlu0 %1698 }
 0x1e2   : > { %1805 = vst.msk [vmem:[#allocation2 + $0xb0] sm:$0xff] %vm1782_vm8, %v1731_v30  ;;  %1789 = vst.msk [vmem:[#allocation2 + $0x30] sm:$0xff] %vm1782_vm8, %v1699_v31 }
 0x1e3   : > { %1551 = vrot.lane.b32.xlu1 %v2413_v16, %s2660_s16 }
 0x1e4   : > { %1519 = vrot.lane.b32.xlu0 %v2397_v18, %s2660_s16 }
 0x1e5   : > { %v964_v15 = vpop.permute.xlu1 %963 }
 0x1e6   : > { %v932_v57 = vpop.permute.xlu0 %931  ;;  %1035 = vst.msk [vmem:[#allocation2 + $0xc8] sm:$0xff] %vm1009_vm4, %v964_v15 }
 0x1e7   : > { %1019 = vst.msk [vmem:[#allocation2 + $0x48] sm:$0xff] %vm1009_vm4, %v932_v57  ;;  %1742 = vrot.lane.b32.xlu1 %v2444_v6, %s2661_s6 }
 0x1e8   : > { %1710 = vrot.lane.b32.xlu0 %v2428_v48, %s2661_s6 }
 0x1e9   : > { %v1155_v58 = vpop.permute.xlu1 %1154  ;;  %v1821_v32 = vld [vmem:[#allocation2 + $0x30] sm:$0xff] }
 0x1ea   : > { %v1123_v29 = vpop.permute.xlu0 %1122  ;;  %v1837_v1 = vld [vmem:[#allocation2 + $0xb0] sm:$0xff]  ;;  %1227 = vst.msk [vmem:[#allocation2 + $0xc0] sm:$0xff] %vm1202_vm5, %v1155_v58  ;;  %2540 = vmatprep.mubr.f32.mxu0 %v1821_v32 }
 0x1eb   : > { %1211 = vst.msk [vmem:[#allocation2 + $0x40] sm:$0xff] %vm1202_vm5, %v1123_v29  ;;  %2564 = vmatprep.mubr.f32.mxu1 %v1837_v1  ;;  %975 = vrot.lane.b32.xlu1 %v2413_v16, %s2657_s22 }
 0x1ec   : > { %943 = vrot.lane.b32.xlu0 %v2397_v18, %s2657_s22 }
 0x1ed   : > { %v1733_v3 = vpop.permute.xlu1 %1732 }
 0x1ee   : > { %v1701_v43 = vpop.permute.xlu0 %1700  ;;  %1806 = vst.msk [vmem:[#allocation2 + $0xb8] sm:$0xff] %vm1782_vm8, %v1733_v3 }
 0x1ef   : > { %1790 = vst.msk [vmem:[#allocation2 + $0x38] sm:$0xff] %vm1782_vm8, %v1701_v43  ;;  %1166 = vrot.lane.b32.xlu1 %v2444_v6, %s2658_s23 }
 0x1f0   : > { %1134 = vrot.lane.b32.xlu0 %v2428_v48, %s2658_s23 }
 0x1f1   : > { %v1157_v9 = vpop.permute.xlu1 %1156 }
 0x1f2   : > { %v1125_v50 = vpop.permute.xlu0 %1124  ;;  %1228 = vst.msk [vmem:[#allocation2 + $0xc8] sm:$0xff] %vm1202_vm5, %v1157_v9 }
 0x1f3   : > { %1212 = vst.msk [vmem:[#allocation2 + $0x48] sm:$0xff] %vm1202_vm5, %v1125_v50  ;;  %1744 = vrot.lane.b32.xlu1 %v2445_v44, %s2661_s6 }
 0x1f4   : > { %1712 = vrot.lane.b32.xlu0 %v2429_v33, %s2661_s6 }
 0x1f5   : > { %v1349_v61 = vpop.permute.xlu1 %1348  ;;  %v1838_v49 = vld [vmem:[#allocation2 + $0xb8] sm:$0xff] }
 0x1f6   : > { %v1317_v34 = vpop.permute.xlu0 %1316  ;;  %v1822_v28 = vld [vmem:[#allocation2 + $0x38] sm:$0xff]  ;;  %1421 = vst.msk [vmem:[#allocation2 + $0xc0] sm:$0xff] %vm1396_vm6, %v1349_v61  ;;  %2565 = vmatmul.mubr.f32.gmra.mrb[6].mxu1 %v1838_v49 }
 0x1f7   : > { %1405 = vst.msk [vmem:[#allocation2 + $0x40] sm:$0xff] %vm1396_vm6, %v1317_v34  ;;  %2541 = vmatmul.mubr.f32.gmra.mrb[6].mxu0 %v1822_v28  ;;  %1168 = vrot.lane.b32.xlu1 %v2445_v44, %s2658_s23 }
 0x1f8   : > { %1136 = vrot.lane.b32.xlu0 %v2429_v33, %s2658_s23 }
 0x1f9   : > { %v1351_v47 = vpop.permute.xlu1 %1350 }
 0x1fa   : > { %v1319_v11 = vpop.permute.xlu0 %1318  ;;  %1422 = vst.msk [vmem:[#allocation2 + $0xc8] sm:$0xff] %vm1396_vm6, %v1351_v47 }
 0x1fb   : > { %1406 = vst.msk [vmem:[#allocation2 + $0x48] sm:$0xff] %vm1396_vm6, %v1319_v11  ;;  %1360 = vrot.lane.b32.xlu1 %v2382_v27, %s2659_s5  ;;  %v3681_v27 = vld [vmem:[%s3815_s2] ss:$0 sm:$0xff] }
 0x1fc   : > { %1328 = vrot.lane.b32.xlu0 %v2366_v5, %s2659_s5 }
 0x1fd   : > { %v1542_v36 = vpop.permute.xlu1 %1541 }
 0x1fe   : > { %v1510_v10 = vpop.permute.xlu0 %1509  ;;  %1614 = vst.msk [vmem:[#allocation2 + $0xc0] sm:$0xff] %vm1589_vm7, %v1542_v36 }
 0x1ff   : > { %1598 = vst.msk [vmem:[#allocation2 + $0x40] sm:$0xff] %vm1589_vm7, %v1510_v10  ;;  %1362 = vrot.lane.b32.xlu1 %v2383_v63, %s2659_s5 }
 0x200   : > { %1330 = vrot.lane.b32.xlu0 %v2367_v35, %s2659_s5 }
 0x201   : > { %v966_v42 = vpop.permute.xlu1 %965 }
 0x202   : > { %v934_v23 = vpop.permute.xlu0 %933  ;;  %1036 = vst.msk [vmem:[#allocation2 + $0xd0] sm:$0xff] %vm1009_vm4, %v966_v42 }
 0x203   : > { %1020 = vst.msk [vmem:[#allocation2 + $0x50] sm:$0xff] %vm1009_vm4, %v934_v23  ;;  %1553 = vrot.lane.b32.xlu1 %v2414_v62, %s2660_s16 }
 0x204   : > { %1521 = vrot.lane.b32.xlu0 %v2398_v24, %s2660_s16 }
 0x205   : > { %v1544_v60 = vpop.permute.xlu1 %1543 }
 0x206   : > { %v1512_v37 = vpop.permute.xlu0 %1511  ;;  %1615 = vst.msk [vmem:[#allocation2 + $0xc8] sm:$0xff] %vm1589_vm7, %v1544_v60 }
 0x207   : > { %1599 = vst.msk [vmem:[#allocation2 + $0x48] sm:$0xff] %vm1589_vm7, %v1512_v37  ;;  %1555 = vrot.lane.b32.xlu1 %v2415_v41, %s2660_s16 }
 0x208   : > { %1523 = vrot.lane.b32.xlu0 %v2399_v7, %s2660_s16 }
 0x209   : > { %v1735_v38 = vpop.permute.xlu1 %1734 }
 0x20a   : > { %v1703_v55 = vpop.permute.xlu0 %1702  ;;  %1807 = vst.msk [vmem:[#allocation2 + $0xc0] sm:$0xff] %vm1782_vm8, %v1735_v38 }
 0x20b   : > { %1791 = vst.msk [vmem:[#allocation2 + $0x40] sm:$0xff] %vm1782_vm8, %v1703_v55  ;;  %1746 = vrot.lane.b32.xlu1 %v2446_v8, %s2661_s6 }
 0x20c   : > { %1714 = vrot.lane.b32.xlu0 %v2430_v52, %s2661_s6 }
 0x20d   : > { %v968_v51 = vpop.permute.xlu1 %967 }
 0x20e   : > { %v936_v56 = vpop.permute.xlu0 %935  ;;  %1037 = vst.msk [vmem:[#allocation2 + $0xd8] sm:$0xff] %vm1009_vm4, %v968_v51 }
 0x20f   : > { %1021 = vst.msk [vmem:[#allocation2 + $0x58] sm:$0xff] %vm1009_vm4, %v936_v56  ;;  %1748 = vrot.lane.b32.xlu1 %v2447_v21, %s2661_s6 }
 0x210   : > { %1716 = vrot.lane.b32.xlu0 %v2431_v40, %s2661_s6 }
 0x211   : > { %v1159_v14 = vpop.permute.xlu1 %1158  ;;  %v1839_v17 = vld [vmem:[#allocation2 + $0xc0] sm:$0xff] }
 0x212   : > { %v1127_v2 = vpop.permute.xlu0 %1126  ;;  %v1823_v13 = vld [vmem:[#allocation2 + $0x40] sm:$0xff]  ;;  %1229 = vst.msk [vmem:[#allocation2 + $0xd0] sm:$0xff] %vm1202_vm5, %v1159_v14  ;;  %2567 = vmatprep.mubr.f32.mxu1 %v1839_v17 }
 0x213   : > { %1213 = vst.msk [vmem:[#allocation2 + $0x50] sm:$0xff] %vm1202_vm5, %v1127_v2  ;;  %2543 = vmatprep.mubr.f32.mxu0 %v1823_v13 }
 0x215   : > { %v1737_v12 = vpop.permute.xlu1 %1736 }
 0x216   : > { %v1705_v0 = vpop.permute.xlu0 %1704  ;;  %1808 = vst.msk [vmem:[#allocation2 + $0xc8] sm:$0xff] %vm1782_vm8, %v1737_v12 }
 0x217   : > { %1792 = vst.msk [vmem:[#allocation2 + $0x48] sm:$0xff] %vm1782_vm8, %v1705_v0 }
 0x219   : > { %v1161_v46 = vpop.permute.xlu1 %1160 }
 0x21a   : > { %v1129_v54 = vpop.permute.xlu0 %1128  ;;  %1230 = vst.msk [vmem:[#allocation2 + $0xd8] sm:$0xff] %vm1202_vm5, %v1161_v46 }
 0x21b   : > { %1214 = vst.msk [vmem:[#allocation2 + $0x58] sm:$0xff] %vm1202_vm5, %v1129_v54 }
 0x21d   : > { %v1353_v20 = vpop.permute.xlu1 %1352  ;;  %v1840_v45 = vld [vmem:[#allocation2 + $0xc8] sm:$0xff] }
 0x21e   : > { %v1321_v53 = vpop.permute.xlu0 %1320  ;;  %v1824_v26 = vld [vmem:[#allocation2 + $0x48] sm:$0xff]  ;;  %1423 = vst.msk [vmem:[#allocation2 + $0xd0] sm:$0xff] %vm1396_vm6, %v1353_v20  ;;  %2568 = vmatmul.mubr.f32.gmra.mrb[8].mxu1 %v1840_v45 }
 0x21f   : > { %1407 = vst.msk [vmem:[#allocation2 + $0x50] sm:$0xff] %vm1396_vm6, %v1321_v53  ;;  %2544 = vmatmul.mubr.f32.gmra.mrb[8].mxu0 %v1824_v26 }
 0x221   : > { %v1355_v25 = vpop.permute.xlu1 %1354 }
 0x222   : > { %v1323_v39 = vpop.permute.xlu0 %1322  ;;  %1424 = vst.msk [vmem:[#allocation2 + $0xd8] sm:$0xff] %vm1396_vm6, %v1355_v25 }
 0x223   : > { %1408 = vst.msk [vmem:[#allocation2 + $0x58] sm:$0xff] %vm1396_vm6, %v1323_v39 }
 0x225   : > { %v1546_v59 = vpop.permute.xlu1 %1545 }
 0x226   : > { %v1514_v4 = vpop.permute.xlu0 %1513  ;;  %1616 = vst.msk [vmem:[#allocation2 + $0xd0] sm:$0xff] %vm1589_vm7, %v1546_v59 }
 0x227   : > { %1600 = vst.msk [vmem:[#allocation2 + $0x50] sm:$0xff] %vm1589_vm7, %v1514_v4 }
 0x229   : > { %v970_v19 = vpop.permute.xlu1 %969 }
 0x22a   : > { %v938_v22 = vpop.permute.xlu0 %937  ;;  %1038 = vst.msk [vmem:[#allocation2 + $0xe0] sm:$0xff] %vm1009_vm4, %v970_v19 }
 0x22b   : > { %1022 = vst.msk [vmem:[#allocation2 + $0x60] sm:$0xff] %vm1009_vm4, %v938_v22 }
 0x22d   : > { %v1548_v16 = vpop.permute.xlu1 %1547 }
 0x22e   : > { %v1516_v18 = vpop.permute.xlu0 %1515  ;;  %1617 = vst.msk [vmem:[#allocation2 + $0xd8] sm:$0xff] %vm1589_vm7, %v1548_v16 }
 0x22f   : > { %1601 = vst.msk [vmem:[#allocation2 + $0x58] sm:$0xff] %vm1589_vm7, %v1516_v18 }
 0x231   : > { %v1739_v30 = vpop.permute.xlu1 %1738 }
 0x232   : > { %v1707_v31 = vpop.permute.xlu0 %1706  ;;  %1809 = vst.msk [vmem:[#allocation2 + $0xd0] sm:$0xff] %vm1782_vm8, %v1739_v30 }
 0x233   : > { %1793 = vst.msk [vmem:[#allocation2 + $0x50] sm:$0xff] %vm1782_vm8, %v1707_v31 }
 0x235   : > { %v972_v6 = vpop.permute.xlu1 %971 }
 0x236   : > { %v940_v48 = vpop.permute.xlu0 %939  ;;  %1039 = vst.msk [vmem:[#allocation2 + $0xe8] sm:$0xff] %vm1009_vm4, %v972_v6 }
 0x237   : > { %1023 = vst.msk [vmem:[#allocation2 + $0x68] sm:$0xff] %vm1009_vm4, %v940_v48 }
 0x239   : > { %v1163_v15 = vpop.permute.xlu1 %1162  ;;  %v1841_v29 = vld [vmem:[#allocation2 + $0xd0] sm:$0xff] }
 0x23a   : > { %v1131_v57 = vpop.permute.xlu0 %1130  ;;  %v1825_v58 = vld [vmem:[#allocation2 + $0x50] sm:$0xff]  ;;  %1231 = vst.msk [vmem:[#allocation2 + $0xe0] sm:$0xff] %vm1202_vm5, %v1163_v15  ;;  %2570 = vmatprep.mubr.f32.mxu1 %v1841_v29 }
 0x23b   : > { %1215 = vst.msk [vmem:[#allocation2 + $0x60] sm:$0xff] %vm1202_vm5, %v1131_v57  ;;  %2546 = vmatprep.mubr.f32.mxu0 %v1825_v58 }
 0x23d   : > { %v1741_v32 = vpop.permute.xlu1 %1740 }
 0x23e   : > { %v1709_v1 = vpop.permute.xlu0 %1708  ;;  %1810 = vst.msk [vmem:[#allocation2 + $0xd8] sm:$0xff] %vm1782_vm8, %v1741_v32 }
 0x23f   : > { %1794 = vst.msk [vmem:[#allocation2 + $0x58] sm:$0xff] %vm1782_vm8, %v1709_v1 }
 0x241   : > { %v1165_v3 = vpop.permute.xlu1 %1164 }
 0x242   : > { %v1133_v43 = vpop.permute.xlu0 %1132  ;;  %1232 = vst.msk [vmem:[#allocation2 + $0xe8] sm:$0xff] %vm1202_vm5, %v1165_v3 }
 0x243   : > { %1216 = vst.msk [vmem:[#allocation2 + $0x68] sm:$0xff] %vm1202_vm5, %v1133_v43 }
 0x245   : > { %v1357_v44 = vpop.permute.xlu1 %1356  ;;  %v1842_v50 = vld [vmem:[#allocation2 + $0xd8] sm:$0xff] }
 0x246   : > { %v1325_v33 = vpop.permute.xlu0 %1324  ;;  %v1826_v9 = vld [vmem:[#allocation2 + $0x58] sm:$0xff]  ;;  %1425 = vst.msk [vmem:[#allocation2 + $0xe0] sm:$0xff] %vm1396_vm6, %v1357_v44  ;;  %2571 = vmatmul.mubr.f32.gmra.mrb[10].mxu1 %v1842_v50 }
 0x247   : > { %1409 = vst.msk [vmem:[#allocation2 + $0x60] sm:$0xff] %vm1396_vm6, %v1325_v33  ;;  %2547 = vmatmul.mubr.f32.gmra.mrb[10].mxu0 %v1826_v9 }
 0x249   : > { %v1359_v61 = vpop.permute.xlu1 %1358 }
 0x24a   : > { %v1327_v34 = vpop.permute.xlu0 %1326  ;;  %1426 = vst.msk [vmem:[#allocation2 + $0xe8] sm:$0xff] %vm1396_vm6, %v1359_v61 }
 0x24b   : > { %1410 = vst.msk [vmem:[#allocation2 + $0x68] sm:$0xff] %vm1396_vm6, %v1327_v34 }
 0x24d   : > { %v1550_v28 = vpop.permute.xlu1 %1549 }
 0x24e   : > { %v1518_v49 = vpop.permute.xlu0 %1517  ;;  %1618 = vst.msk [vmem:[#allocation2 + $0xe0] sm:$0xff] %vm1589_vm7, %v1550_v28 }
 0x24f   : > { %1602 = vst.msk [vmem:[#allocation2 + $0x60] sm:$0xff] %vm1589_vm7, %v1518_v49 }
 0x251   : > { %v974_v5 = vpop.permute.xlu1 %973  ;;  %v2533_v11 = vpop.f32.mrb[0].mxu0 }
 0x252   : > { %v942_v47 = vpop.permute.xlu0 %941  ;;  %1040 = vst.msk [vmem:[#allocation2 + $0xf0] sm:$0xff] %vm1009_vm4, %v974_v5  ;;  %v2557_v63 = vpop.f32.mrb[0].mxu1  ;;  %v2096_v35 = vadd.f32 %v2533_v11, %v3681_v27 }
 0x253   : > { %1024 = vst.msk [vmem:[#allocation2 + $0x70] sm:$0xff] %vm1009_vm4, %v942_v47  ;;  %v2112_v36 = vadd.f32 %v2557_v63, %v3681_v27  ;;  %v1929_v10 = vpop.f32.mrb[1].mxu0  ;;  %v2009_v62 = vpop.f32.mrb[1].mxu1 }
 0x254   : > { %v2095_v24 = vadd.f32 %v3681_v27, %v1929_v10  ;;  %v2111_v42 = vadd.f32 %v3681_v27, %v2009_v62  ;;  %v2128_v23 = vmax.f32 %v2096_v35, 0.0 }
 0x255   : > { %v2144_v41 = vmax.f32 %v2112_v36, 0.0  ;;  %v1552_v7 = vpop.permute.xlu1 %1551 }
 0x256   : > { %v1520_v60 = vpop.permute.xlu0 %1519  ;;  %v2127_v37 = vmax.f32 %v2095_v24, 0.0  ;;  %v2143_v8 = vmax.f32 %v2111_v42, 0.0  ;;  %1619 = vst.msk [vmem:[#allocation2 + $0xe8] sm:$0xff] %vm1589_vm7, %v1552_v7 }
 0x257   : > { %1603 = vst.msk [vmem:[#allocation2 + $0x68] sm:$0xff] %vm1589_vm7, %v1520_v60 }
 0x258   : > { %2161 = vst.msk [vmem:[%s3690_s14 + $0x8] sm:$0xff] %vm2159_vm9, %v2128_v23  ;;  %2177 = vst.msk [vmem:[%s3690_s14 + $0x88] sm:$0xff] %vm2159_vm9, %v2144_v41 }
 0x259   : > { %2160 = vst.msk [vmem:[%s3690_s14] sm:$0xff] %vm2159_vm9, %v2127_v37  ;;  %2176 = vst.msk [vmem:[%s3690_s14 + $0x80] sm:$0xff] %vm2159_vm9, %v2143_v8  ;;  %v1743_v52 = vpop.permute.xlu1 %1742 }
 0x25a   : > { %v1711_v38 = vpop.permute.xlu0 %1710  ;;  %1811 = vst.msk [vmem:[#allocation2 + $0xe0] sm:$0xff] %vm1782_vm8, %v1743_v52 }
 0x25b   : > { %1795 = vst.msk [vmem:[#allocation2 + $0x60] sm:$0xff] %vm1782_vm8, %v1711_v38 }
 0x25d   : > { %v976_v55 = vpop.permute.xlu1 %975 }
 0x25e   : > { %v944_v21 = vpop.permute.xlu0 %943  ;;  %1041 = vst.msk [vmem:[#allocation2 + $0xf8] sm:$0xff] %vm1009_vm4, %v976_v55 }
 0x25f   : > { %1025 = vst.msk [vmem:[#allocation2 + $0x78] sm:$0xff] %vm1009_vm4, %v944_v21 }
 0x261   : > { %v1167_v40 = vpop.permute.xlu1 %1166  ;;  %v1843_v14 = vld [vmem:[#allocation2 + $0xe0] sm:$0xff] }
 0x262   : > { %v1135_v51 = vpop.permute.xlu0 %1134  ;;  %v1827_v56 = vld [vmem:[#allocation2 + $0x60] sm:$0xff]  ;;  %1233 = vst.msk [vmem:[#allocation2 + $0xf0] sm:$0xff] %vm1202_vm5, %v1167_v40  ;;  %2573 = vmatprep.mubr.f32.mxu1 %v1843_v14 }
 0x263   : > { %1217 = vst.msk [vmem:[#allocation2 + $0x70] sm:$0xff] %vm1202_vm5, %v1135_v51  ;;  %2549 = vmatprep.mubr.f32.mxu0 %v1827_v56 }
 0x265   : > { %v1745_v2 = vpop.permute.xlu1 %1744 }
 0x266   : > { %v1713_v13 = vpop.permute.xlu0 %1712  ;;  %1812 = vst.msk [vmem:[#allocation2 + $0xe8] sm:$0xff] %vm1782_vm8, %v1745_v2 }
 0x267   : > { %1796 = vst.msk [vmem:[#allocation2 + $0x68] sm:$0xff] %vm1782_vm8, %v1713_v13 }
 0x269   : > { %v1169_v17 = vpop.permute.xlu1 %1168 }
 0x26a   : > { %v1137_v12 = vpop.permute.xlu0 %1136  ;;  %1234 = vst.msk [vmem:[#allocation2 + $0xf8] sm:$0xff] %vm1202_vm5, %v1169_v17 }
 0x26b   : > { %1218 = vst.msk [vmem:[#allocation2 + $0x78] sm:$0xff] %vm1202_vm5, %v1137_v12 }
 0x26d   : > { %v1361_v0 = vpop.permute.xlu1 %1360  ;;  %v1844_v20 = vld [vmem:[#allocation2 + $0xe8] sm:$0xff] }
 0x26e   : > { %v1329_v46 = vpop.permute.xlu0 %1328  ;;  %v1828_v54 = vld [vmem:[#allocation2 + $0x68] sm:$0xff]  ;;  %1427 = vst.msk [vmem:[#allocation2 + $0xf0] sm:$0xff] %vm1396_vm6, %v1361_v0  ;;  %2574 = vmatmul.mubr.f32.gmra.mrb[12].mxu1 %v1844_v20 }
 0x26f   : > { %1411 = vst.msk [vmem:[#allocation2 + $0x70] sm:$0xff] %vm1396_vm6, %v1329_v46  ;;  %2550 = vmatmul.mubr.f32.gmra.mrb[12].mxu0 %v1828_v54 }
 0x271   : > { %v1363_v53 = vpop.permute.xlu1 %1362 }
 0x272   : > { %v1331_v26 = vpop.permute.xlu0 %1330  ;;  %1428 = vst.msk [vmem:[#allocation2 + $0xf8] sm:$0xff] %vm1396_vm6, %v1363_v53 }
 0x273   : > { %1412 = vst.msk [vmem:[#allocation2 + $0x78] sm:$0xff] %vm1396_vm6, %v1331_v26 }
 0x275   : > { %v1554_v45 = vpop.permute.xlu1 %1553 }
 0x276   : > { %v1522_v25 = vpop.permute.xlu0 %1521  ;;  %1620 = vst.msk [vmem:[#allocation2 + $0xf0] sm:$0xff] %vm1589_vm7, %v1554_v45 }
 0x277   : > { %1604 = vst.msk [vmem:[#allocation2 + $0x70] sm:$0xff] %vm1589_vm7, %v1522_v25 }
 0x279   : > { %v1556_v39 = vpop.permute.xlu1 %1555  ;;  %v2536_v4 = vpop.f32.mrb[2].mxu0 }
 0x27a   : > { %v1524_v59 = vpop.permute.xlu0 %1523  ;;  %1621 = vst.msk [vmem:[#allocation2 + $0xf8] sm:$0xff] %vm1589_vm7, %v1556_v39  ;;  %v2560_v19 = vpop.f32.mrb[2].mxu1  ;;  %v2098_v22 = vadd.f32 %v2536_v4, %v3681_v27 }
 0x27b   : > { %1605 = vst.msk [vmem:[#allocation2 + $0x78] sm:$0xff] %vm1589_vm7, %v1524_v59  ;;  %v2114_v16 = vadd.f32 %v2560_v19, %v3681_v27  ;;  %v1939_v18 = vpop.f32.mrb[3].mxu0  ;;  %v2019_v30 = vpop.f32.mrb[3].mxu1 }
 0x27c   : > { %v2097_v31 = vadd.f32 %v3681_v27, %v1939_v18  ;;  %v2113_v6 = vadd.f32 %v3681_v27, %v2019_v30  ;;  %v2130_v48 = vmax.f32 %v2098_v22, 0.0 }
 0x27d   : > { %v2146_v15 = vmax.f32 %v2114_v16, 0.0  ;;  %v1747_v57 = vpop.permute.xlu1 %1746 }
 0x27e   : > { %v1715_v58 = vpop.permute.xlu0 %1714  ;;  %v2129_v29 = vmax.f32 %v2097_v31, 0.0  ;;  %v2145_v32 = vmax.f32 %v2113_v6, 0.0  ;;  %1813 = vst.msk [vmem:[#allocation2 + $0xf0] sm:$0xff] %vm1782_vm8, %v1747_v57 }
 0x27f   : > { %1797 = vst.msk [vmem:[#allocation2 + $0x70] sm:$0xff] %vm1782_vm8, %v1715_v58 }
 0x280   : > { %2163 = vst.msk [vmem:[%s3690_s14 + $0x18] sm:$0xff] %vm2159_vm9, %v2130_v48  ;;  %2179 = vst.msk [vmem:[%s3690_s14 + $0x98] sm:$0xff] %vm2159_vm9, %v2146_v15 }
 0x281   : > { %2162 = vst.msk [vmem:[%s3690_s14 + $0x10] sm:$0xff] %vm2159_vm9, %v2129_v29  ;;  %2178 = vst.msk [vmem:[%s3690_s14 + $0x90] sm:$0xff] %vm2159_vm9, %v2145_v32  ;;  %v1749_v1 = vpop.permute.xlu1 %1748 }
 0x282   : > { %v1717_v3 = vpop.permute.xlu0 %1716  ;;  %1814 = vst.msk [vmem:[#allocation2 + $0xf8] sm:$0xff] %vm1782_vm8, %v1749_v1 }
 0x283   : > { %1798 = vst.msk [vmem:[#allocation2 + $0x78] sm:$0xff] %vm1782_vm8, %v1717_v3 }
 0x285   : > { %v1845_v44 = vld [vmem:[#allocation2 + $0xf0] sm:$0xff] }
 0x286   : > { %v1829_v43 = vld [vmem:[#allocation2 + $0x70] sm:$0xff]  ;;  %2576 = vmatprep.mubr.f32.mxu1 %v1845_v44 }
 0x287   : > { %2552 = vmatprep.mubr.f32.mxu0 %v1829_v43 }
 0x289   : > { %v1846_v9 = vld [vmem:[#allocation2 + $0xf8] sm:$0xff] }
 0x28a   : > { %v1830_v33 = vld [vmem:[#allocation2 + $0x78] sm:$0xff]  ;;  %2577 = vmatmul.mubr.f32.gmra.mrb[14].mxu1 %v1846_v9 }
 0x28b   : > { %2553 = vmatmul.mubr.f32.gmra.mrb[14].mxu0 %v1830_v33 }
 0x2a1   : > { %v2539_v50 = vpop.f32.mrb[4].mxu0 }
 0x2a2   : > { %v2563_v61 = vpop.f32.mrb[4].mxu1  ;;  %v2100_v34 = vadd.f32 %v2539_v50, %v3681_v27  ;;  %v1949_v49 = vpop.f32.mrb[5].mxu0 }
 0x2a3   : > { %v2116_v28 = vadd.f32 %v2563_v61, %v3681_v27  ;;  %v2029_v5 = vpop.f32.mrb[5].mxu1  ;;  %v2099_v47 = vadd.f32 %v3681_v27, %v1949_v49 }
 0x2a4   : > { %v2115_v11 = vadd.f32 %v3681_v27, %v2029_v5  ;;  %v2132_v63 = vmax.f32 %v2100_v34, 0.0 }
 0x2a5   : > { %v2148_v35 = vmax.f32 %v2116_v28, 0.0  ;;  %v2131_v36 = vmax.f32 %v2099_v47, 0.0 }
 0x2a6   : > { %v2147_v10 = vmax.f32 %v2115_v11, 0.0  ;;  %2165 = vst.msk [vmem:[%s3690_s14 + $0x28] sm:$0xff] %vm2159_vm9, %v2132_v63 }
 0x2a7   : > { %2181 = vst.msk [vmem:[%s3690_s14 + $0xa8] sm:$0xff] %vm2159_vm9, %v2148_v35  ;;  %2164 = vst.msk [vmem:[%s3690_s14 + $0x20] sm:$0xff] %vm2159_vm9, %v2131_v36 }
 0x2a8   : > { %2180 = vst.msk [vmem:[%s3690_s14 + $0xa0] sm:$0xff] %vm2159_vm9, %v2147_v10 }
 0x2c9   : > { %v2566_v24 = vpop.f32.mrb[6].mxu1 }
 0x2ca   : > { %v2542_v62 = vpop.f32.mrb[6].mxu0  ;;  %v2118_v23 = vadd.f32 %v2566_v24, %v3681_v27  ;;  %v2039_v7 = vpop.f32.mrb[7].mxu1 }
 0x2cb   : > { %v2102_v42 = vadd.f32 %v2542_v62, %v3681_v27  ;;  %v1959_v41 = vpop.f32.mrb[7].mxu0  ;;  %v2117_v37 = vadd.f32 %v3681_v27, %v2039_v7 }
 0x2cc   : > { %v2101_v60 = vadd.f32 %v3681_v27, %v1959_v41  ;;  %v2150_v52 = vmax.f32 %v2118_v23, 0.0 }
 0x2cd   : > { %v2134_v8 = vmax.f32 %v2102_v42, 0.0  ;;  %v2149_v55 = vmax.f32 %v2117_v37, 0.0 }
 0x2ce   : > { %v2133_v38 = vmax.f32 %v2101_v60, 0.0  ;;  %2183 = vst.msk [vmem:[%s3690_s14 + $0xb8] sm:$0xff] %vm2159_vm9, %v2150_v52 }
 0x2cf   : > { %2167 = vst.msk [vmem:[%s3690_s14 + $0x38] sm:$0xff] %vm2159_vm9, %v2134_v8  ;;  %2182 = vst.msk [vmem:[%s3690_s14 + $0xb0] sm:$0xff] %vm2159_vm9, %v2149_v55 }
 0x2d0   : > { %2166 = vst.msk [vmem:[%s3690_s14 + $0x30] sm:$0xff] %vm2159_vm9, %v2133_v38 }
 0x2f1   : > { %v2569_v40 = vpop.f32.mrb[8].mxu1 }
 0x2f2   : > { %v2545_v21 = vpop.f32.mrb[8].mxu0  ;;  %v2120_v56 = vadd.f32 %v2569_v40, %v3681_v27  ;;  %v2049_v2 = vpop.f32.mrb[9].mxu1 }
 0x2f3   : > { %v2104_v51 = vadd.f32 %v2545_v21, %v3681_v27  ;;  %v1969_v14 = vpop.f32.mrb[9].mxu0  ;;  %v2119_v17 = vadd.f32 %v3681_v27, %v2049_v2 }
 0x2f4   : > { %v2103_v13 = vadd.f32 %v3681_v27, %v1969_v14  ;;  %v2152_v0 = vmax.f32 %v2120_v56, 0.0 }
 0x2f5   : > { %v2136_v12 = vmax.f32 %v2104_v51, 0.0  ;;  %v2151_v54 = vmax.f32 %v2119_v17, 0.0 }
 0x2f6   : > { %v2135_v46 = vmax.f32 %v2103_v13, 0.0  ;;  %2185 = vst.msk [vmem:[%s3690_s14 + $0xc8] sm:$0xff] %vm2159_vm9, %v2152_v0 }
 0x2f7   : > { %2169 = vst.msk [vmem:[%s3690_s14 + $0x48] sm:$0xff] %vm2159_vm9, %v2136_v12  ;;  %2184 = vst.msk [vmem:[%s3690_s14 + $0xc0] sm:$0xff] %vm2159_vm9, %v2151_v54 }
 0x2f8   : > { %2168 = vst.msk [vmem:[%s3690_s14 + $0x40] sm:$0xff] %vm2159_vm9, %v2135_v46 }
 0x319   : > { %v2572_v53 = vpop.f32.mrb[10].mxu1 }
 0x31a   : > { %v2548_v20 = vpop.f32.mrb[10].mxu0  ;;  %v2122_v45 = vadd.f32 %v2572_v53, %v3681_v27  ;;  %v2059_v39 = vpop.f32.mrb[11].mxu1 }
 0x31b   : > { %v2106_v26 = vadd.f32 %v2548_v20, %v3681_v27  ;;  %v1979_v25 = vpop.f32.mrb[11].mxu0  ;;  %v2121_v4 = vadd.f32 %v3681_v27, %v2059_v39 }
 0x31c   : > { %v2105_v59 = vadd.f32 %v3681_v27, %v1979_v25  ;;  %v2154_v22 = vmax.f32 %v2122_v45, 0.0 }
 0x31d   : > { %v2138_v19 = vmax.f32 %v2106_v26, 0.0  ;;  %v2153_v18 = vmax.f32 %v2121_v4, 0.0 }
 0x31e   : > { %v2137_v16 = vmax.f32 %v2105_v59, 0.0  ;;  %2187 = vst.msk [vmem:[%s3690_s14 + $0xd8] sm:$0xff] %vm2159_vm9, %v2154_v22 }
 0x31f   : > { %2171 = vst.msk [vmem:[%s3690_s14 + $0x58] sm:$0xff] %vm2159_vm9, %v2138_v19  ;;  %2186 = vst.msk [vmem:[%s3690_s14 + $0xd0] sm:$0xff] %vm2159_vm9, %v2153_v18 }
 0x320   : > { %2170 = vst.msk [vmem:[%s3690_s14 + $0x50] sm:$0xff] %vm2159_vm9, %v2137_v16 }
 0x341   : > { %v2575_v31 = vpop.f32.mrb[12].mxu1 }
 0x342   : > { %v2551_v30 = vpop.f32.mrb[12].mxu0  ;;  %v2124_v48 = vadd.f32 %v2575_v31, %v3681_v27  ;;  %v2069_v57 = vpop.f32.mrb[13].mxu1 }
 0x343   : > { %v2108_v6 = vadd.f32 %v2551_v30, %v3681_v27  ;;  %v1989_v15 = vpop.f32.mrb[13].mxu0  ;;  %v2123_v29 = vadd.f32 %v3681_v27, %v2069_v57 }
 0x344   : > { %v2107_v58 = vadd.f32 %v3681_v27, %v1989_v15  ;;  %v2156_v1 = vmax.f32 %v2124_v48, 0.0 }
 0x345   : > { %v2140_v32 = vmax.f32 %v2108_v6, 0.0  ;;  %v2155_v43 = vmax.f32 %v2123_v29, 0.0 }
 0x346   : > { %v2139_v3 = vmax.f32 %v2107_v58, 0.0  ;;  %2189 = vst.msk [vmem:[%s3690_s14 + $0xe8] sm:$0xff] %vm2159_vm9, %v2156_v1 }
 0x347   : > { %2173 = vst.msk [vmem:[%s3690_s14 + $0x68] sm:$0xff] %vm2159_vm9, %v2140_v32  ;;  %2188 = vst.msk [vmem:[%s3690_s14 + $0xe0] sm:$0xff] %vm2159_vm9, %v2155_v43 }
 0x348   : > { %2172 = vst.msk [vmem:[%s3690_s14 + $0x60] sm:$0xff] %vm2159_vm9, %v2139_v3 }
 0x35d   : > { %v2578_v33 = vpop.f32.mrb[14].mxu1 }
 0x35e   : > { %v2554_v44 = vpop.f32.mrb[14].mxu0  ;;  %v2126_v50 = vadd.f32 %v2578_v33, %v3681_v27  ;;  %v2079_v34 = vpop.f32.mrb[15].mxu1 }
 0x35f   : > { %v2110_v9 = vadd.f32 %v2554_v44, %v3681_v27  ;;  %v1999_v61 = vpop.f32.mrb[15].mxu0  ;;  %v2125_v49 = vadd.f32 %v3681_v27, %v2079_v34 }
 0x360   : > { %v2109_v28 = vadd.f32 %v3681_v27, %v1999_v61  ;;  %v2158_v47 = vmax.f32 %v2126_v50, 0.0 }
 0x361   : > { %v2142_v5 = vmax.f32 %v2110_v9, 0.0  ;;  %v2157_v63 = vmax.f32 %v2125_v49, 0.0 }
 0x362   : > { %v2141_v11 = vmax.f32 %v2109_v28, 0.0  ;;  %2191 = vst.msk [vmem:[%s3690_s14 + $0xf8] sm:$0xff] %vm2159_vm9, %v2158_v47 }
 0x363   : > { %2175 = vst.msk [vmem:[%s3690_s14 + $0x78] sm:$0xff] %vm2159_vm9, %v2142_v5  ;;  %2190 = vst.msk [vmem:[%s3690_s14 + $0xf0] sm:$0xff] %vm2159_vm9, %v2157_v63 }
 0x364   : > { %2174 = vst.msk [vmem:[%s3690_s14 + $0x70] sm:$0xff] %vm2159_vm9, %v2141_v11 }
 0x365 PF: > { %s13_s12 = sadd.s32 1, %s2651_s12  }
 0x366   : > { %p10_p5 = scmp.ge.s32.totalorder %s13_s12, 4  }
 0x368   :  { %12 = sbr.rel (!%p10_p5) target bundleno = 1 (0x1), region = 64 }

</bundles_post_ra>
